<compile_context>
chip_gen: v6e
topology: v6e:2x2x1
jax: 0.10.0
libtpu: 0.0.40
codegen_flags: <defaults>
</compile_context>

<pallas_src>
import functools

import jax
import jax.numpy as jnp
from jax.experimental import pallas as pl
from jax.experimental.pallas import tpu as pltpu

# -------------------- problem sizes ------------------------------------------
N_NODES = 64     # nodes per graph
NFEAT = 16       # input feature dim
NHID = 32        # hidden dim
NUM_HOPS = 4     # number of GCN layers
N_GRAPHS = 8     # graphs batched per pallas_call (grid axis)
NH_PAD = 128     # hidden dim padded to full lane width
BN_EPS = 1e-5


# ------------------------------ Pallas kernel --------------------------------
def dgmlp_kernel(x_ref, adj_ref, w_ref, sp_ref, out_ref, *, num_hops):
    # Packed small-parameter slab row layout.
    L = num_hops - 1
    ROW_B0 = 0
    ROW_BS = 1
    ROW_GAMMA = 1 + L
    ROW_BETA = 1 + 2 * L
    ROW_WA1 = 1 + 3 * L
    ROW_WA2 = 2 + 3 * L
    ROW_BA = 3 + 3 * L

    def row(r):                       # [1, NH_PAD] f32 slice of the slab
        return sp_ref[r:r + 1, :]

    x_in = x_ref[0]                   # [N, NH_PAD] bf16 (feature-padded)
    adj = adj_ref[0]                  # [N, N]      bf16

    # --- conv0: adj @ (x @ W0) + b0 (bias after propagation, like PyG GCNConv)
    h = jnp.dot(x_in, w_ref[0], preferred_element_type=jnp.float32)
    x = jnp.dot(adj, h.astype(jnp.bfloat16),
                preferred_element_type=jnp.float32) + row(ROW_B0)
    x_input = x                       # f32 [N, NH_PAD]

    wa1 = row(ROW_WA1)
    wa2 = row(ROW_WA2)
    ba = sp_ref[ROW_BA:ROW_BA + 1, 0:1]               # (1,1)

    # Loop-invariant half of the attention logits (x_input never changes).
    gate_in = jnp.sum(x_input * wa2, axis=-1, keepdims=True) + ba   # [N,1]

    for i in range(1, num_hops):
        # alpha = sigmoid(Linear(cat([x, x_input], dim=1)))  -> [N, 1]
        logits = jnp.sum(x * wa1, axis=-1, keepdims=True) + gate_in
        alpha = jax.nn.sigmoid(logits)

        # (1-alpha)*x + alpha*x_input, with one fewer full-tensor multiply.
        x = x + alpha * (x_input - x)
        x = jnp.maximum(x, 0.0)
        # F.dropout(p=0.0) -> identity

        # GCNConv_i: adj @ (x @ W_i) + b_i   (bf16 operands, f32 accumulation)
        h = jnp.dot(x.astype(jnp.bfloat16), w_ref[i],
                    preferred_element_type=jnp.float32)
        h = jnp.dot(adj, h.astype(jnp.bfloat16),
                    preferred_element_type=jnp.float32) + row(ROW_BS + i - 1)

        # BatchNorm1d (training mode, biased variance) — single-pass stats.
        mean = jnp.mean(h, axis=0, keepdims=True)
        msq = jnp.mean(h * h, axis=0, keepdims=True)
        var = jnp.maximum(msq - mean * mean, 0.0)
        xhat = (h - mean) * jax.lax.rsqrt(var + BN_EPS)
        x = xhat * row(ROW_GAMMA + i - 1) + row(ROW_BETA + i - 1)

    out_ref[0] = x


# ------------------------------ wrapper ---------------------------------------
def dgmlp_forward(x, adj, weights, small, *, num_hops):
    """x: [G,N,NFEAT] f32, adj: [G,N,N] f32, weights: [H,NH_PAD,NH_PAD] bf16,
    small: [3L+4, NH_PAD] f32. Returns [G, N, NH_PAD] f32 (first NHID cols valid)."""
    g, n, nfeat = x.shape
    nh_pad = weights.shape[-1]

    # Layout plumbing outside the kernel: pad features to the lane width, bf16.
    x_p = jnp.pad(x, ((0, 0), (0, 0), (0, nh_pad - nfeat))).astype(jnp.bfloat16)
    adj_b = adj.astype(jnp.bfloat16)

    kernel = functools.partial(dgmlp_kernel, num_hops=num_hops)

    return pl.pallas_call(
        kernel,
        grid=(g,),
        in_specs=[
            pl.BlockSpec((1, n, nh_pad), lambda i: (i, 0, 0)),   # per-graph x
            pl.BlockSpec((1, n, n), lambda i: (i, 0, 0)),        # per-graph adj
            pl.BlockSpec(weights.shape, lambda i: (0, 0, 0)),    # shared weights
            pl.BlockSpec(small.shape, lambda i: (0, 0)),         # shared small params
        ],
        out_specs=pl.BlockSpec((1, n, nh_pad), lambda i: (i, 0, 0)),
        out_shape=jax.ShapeDtypeStruct((g, n, nh_pad), jnp.float32),
        compiler_params=pltpu.CompilerParams(
            dimension_semantics=("parallel",)),
    )(x_p, adj_b, weights, small)


# ------------------------------ param setup / packing -------------------------
def make_params(key, nfeat, nhid, num_hops):
    ks = jax.random.split(key, 8)
    l = num_hops - 1

    def glorot(k, shape):
        fan_in, fan_out = shape[-2], shape[-1]
        lim = jnp.sqrt(6.0 / (fan_in + fan_out))
        return jax.random.uniform(k, shape, jnp.float32, -lim, lim)

    return {
        "w0": glorot(ks[0], (nfeat, nhid)),
        "b0": 0.05 * jax.random.normal(ks[1], (1, nhid), jnp.float32),
        "ws": glorot(ks[2], (l, nhid, nhid)),
        "bs": 0.05 * jax.random.normal(ks[3], (l, 1, nhid), jnp.float32),
        # lr_att: Linear(2*nhid, 1) split into the part hitting x and x_input
        "wa1": 0.1 * glorot(ks[4], (1, nhid)),
        "wa2": 0.1 * glorot(ks[5], (1, nhid)),
        "ba": jnp.full((1, 1), 0.1, jnp.float32),
        "gamma": 1.0 + 0.1 * jax.random.normal(ks[6], (l, 1, nhid), jnp.float32),
        "beta": 0.05 * jax.random.normal(ks[7], (l, 1, nhid), jnp.float32),
    }


def pack_params(params, nfeat, nhid, nh_pad, num_hops):
    """Pack all weights into one bf16 slab and all small params into one f32 slab."""
    l = num_hops - 1

    def padc(a):  # zero-pad last dim to nh_pad
        return jnp.pad(a, [(0, 0)] * (a.ndim - 1) + [(0, nh_pad - a.shape[-1])])

    w0 = jnp.pad(params["w0"], ((0, nh_pad - nfeat), (0, nh_pad - nhid)))
    ws = jnp.pad(params["ws"], ((0, 0), (0, nh_pad - nhid), (0, nh_pad - nhid)))
    weights = jnp.concatenate([w0[None], ws], axis=0).astype(jnp.bfloat16)

    rows = [
        padc(params["b0"]),                                       # row 0
        padc(params["bs"][:, 0, :]),                              # rows 1..L
        padc(params["gamma"][:, 0, :]),                           # rows 1+L..2L
        padc(params["beta"][:, 0, :]),                            # rows 1+2L..3L
        padc(params["wa1"]),                                      # row 1+3L
        padc(params["wa2"]),                                      # row 2+3L
        jnp.full((1, nh_pad), params["ba"][0, 0], jnp.float32),   # row 3+3L
    ]
    small = jnp.concatenate(rows, axis=0)                         # [3L+4, NH_PAD]
    return weights, small


def make_normalized_adj(key, n):
    # random symmetric adjacency + self loops, GCN normalization D^-1/2 (A+I) D^-1/2
    a = (jax.random.uniform(key, (n, n)) < 0.1).astype(jnp.float32)
    a = jnp.maximum(a, a.T)
    a = a + jnp.eye(n, dtype=jnp.float32)
    deg = jnp.sum(a, axis=1)
    d_inv_sqrt = 1.0 / jnp.sqrt(deg)
    return a * d_inv_sqrt[:, None] * d_inv_sqrt[None, :]


# ------------------------------ reference (plain JAX, mirrors bf16 casts) -----
def dgmlp_reference(x, adj, params, num_hops):
    xb = x.astype(jnp.bfloat16)
    adjb = adj.astype(jnp.bfloat16)
    w0 = params["w0"].astype(jnp.bfloat16)

    h = jnp.dot(xb, w0, preferred_element_type=jnp.float32)
    xc = jnp.dot(adjb, h.astype(jnp.bfloat16),
                 preferred_element_type=jnp.float32) + params["b0"]
    x_input = xc
    gate_in = jnp.sum(x_input * params["wa2"], axis=-1, keepdims=True) + params["ba"][0, 0]

    for i in range(1, num_hops):
        logits = jnp.sum(xc * params["wa1"], axis=-1, keepdims=True) + gate_in
        alpha = jax.nn.sigmoid(logits)
        xc = xc + alpha * (x_input - xc)
        xc = jnp.maximum(xc, 0.0)

        wi = params["ws"][i - 1].astype(jnp.bfloat16)
        h = jnp.dot(xc.astype(jnp.bfloat16), wi, preferred_element_type=jnp.float32)
        h = jnp.dot(adjb, h.astype(jnp.bfloat16),
                    preferred_element_type=jnp.float32) + params["bs"][i - 1]

        mean = jnp.mean(h, axis=0, keepdims=True)
        var = jnp.maximum(jnp.mean(h * h, axis=0, keepdims=True) - mean * mean, 0.0)
        xc = (h - mean) * jax.lax.rsqrt(var + BN_EPS) * params["gamma"][i - 1] \
            + params["beta"][i - 1]
    return xc


# ------------------------------ main -------------------------------------------
if __name__ == "__main__":
    key = jax.random.PRNGKey(0)
    k_x, k_adj, k_p = jax.random.split(key, 3)

    x = jax.random.normal(k_x, (N_GRAPHS, N_NODES, NFEAT), jnp.float32)
    adj = jax.vmap(lambda k: make_normalized_adj(k, N_NODES))(
        jax.random.split(k_adj, N_GRAPHS))
    params = make_params(k_p, NFEAT, NHID, NUM_HOPS)
    weights, small = pack_params(params, NFEAT, NHID, NH_PAD, NUM_HOPS)

    out = dgmlp_forward(x, adj, weights, small, num_hops=NUM_HOPS)
    out = jax.block_until_ready(out)
    assert out.shape == (N_GRAPHS, N_NODES, NH_PAD)

    for g in range(N_GRAPHS):
        ref = dgmlp_reference(x[g], adj[g], params, NUM_HOPS)
        assert jnp.allclose(out[g, :, :NHID], ref, atol=3e-3, rtol=3e-3), \
            f"graph {g}: mismatch vs reference"

    print("KERNEL_OK")
</pallas_src>

<mosaic_0001>
module attributes {stable_mosaic.version = 11 : i64} {
  func.func @dgmlp_kernel(%arg0: i32, %arg1: memref<1x64x128xbf16, #tpu.memory_space<vmem>>, %arg2: memref<1x64x64xbf16, #tpu.memory_space<vmem>>, %arg3: memref<4x128x128xbf16, #tpu.memory_space<vmem>>, %arg4: memref<13x128xf32, #tpu.memory_space<vmem>>, %arg5: memref<1x64x128xf32, #tpu.memory_space<vmem>>) attributes {dimension_semantics = [#tpu.dimension_semantics<parallel>], iteration_bounds = array<i64: 8>, scalar_prefetch = 0 : i64, scratch_operands = 0 : i64, tpu.core_type = #tpu.core_type<tc>, window_params = [{transform_indices = @transform_0, window_bounds = array<i64: 1, 64, 128>}, {transform_indices = @transform_1, window_bounds = array<i64: 1, 64, 64>}, {pipeline_mode = #tpu.pipeline_mode<synchronous>, transform_indices = @transform_2, window_bounds = array<i64: 4, 128, 128>}, {pipeline_mode = #tpu.pipeline_mode<synchronous>, transform_indices = @transform_3, window_bounds = array<i64: 13, 128>}, {transform_indices = @transform_4, window_bounds = array<i64: 1, 64, 128>}]} {
    %c0 = arith.constant 0 : index
    %c0_0 = arith.constant 0 : index
    %c0_1 = arith.constant 0 : index
    %0 = vector.load %arg1[%c0, %c0_0, %c0_1] : memref<1x64x128xbf16, #tpu.memory_space<vmem>>, vector<1x64x128xbf16>
    %1 = vector.shape_cast %0 : vector<1x64x128xbf16> to vector<64x128xbf16>
    %c0_2 = arith.constant 0 : index
    %c0_3 = arith.constant 0 : index
    %c0_4 = arith.constant 0 : index
    %2 = vector.load %arg2[%c0_2, %c0_3, %c0_4] : memref<1x64x64xbf16, #tpu.memory_space<vmem>>, vector<1x64x64xbf16>
    %3 = vector.shape_cast %2 : vector<1x64x64xbf16> to vector<64x64xbf16>
    %c0_5 = arith.constant 0 : index
    %c0_6 = arith.constant 0 : index
    %c0_7 = arith.constant 0 : index
    %4 = vector.load %arg3[%c0_5, %c0_6, %c0_7] : memref<4x128x128xbf16, #tpu.memory_space<vmem>>, vector<1x128x128xbf16>
    %5 = vector.shape_cast %4 : vector<1x128x128xbf16> to vector<128x128xbf16>
    %cst = arith.constant dense<0.000000e+00> : vector<64x128xf32>
    %6 = tpu.matmul %1, %5, %cst {dimension_numbers = #tpu.dot_dimension_numbers<[1], [0], [0], [1], [0, 0, 1, 1], [], []>} : vector<64x128xbf16>, vector<128x128xbf16>, vector<64x128xf32> -> vector<64x128xf32>
    %7 = arith.truncf %6 : vector<64x128xf32> to vector<64x128xbf16>
    %cst_8 = arith.constant dense<0.000000e+00> : vector<64x128xf32>
    %8 = tpu.matmul %3, %7, %cst_8 {dimension_numbers = #tpu.dot_dimension_numbers<[1], [0], [0], [1], [0, 0, 1, 1], [], []>} : vector<64x64xbf16>, vector<64x128xbf16>, vector<64x128xf32> -> vector<64x128xf32>
    %c0_9 = arith.constant 0 : index
    %c0_10 = arith.constant 0 : index
    %9 = vector.load %arg4[%c0_9, %c0_10] : memref<13x128xf32, #tpu.memory_space<vmem>>, vector<1x128xf32>
    %10 = vector.broadcast %9 : vector<1x128xf32> to vector<64x128xf32>
    %11 = arith.addf %8, %10 : vector<64x128xf32>
    %c10 = arith.constant 10 : index
    %c0_11 = arith.constant 0 : index
    %12 = vector.load %arg4[%c10, %c0_11] : memref<13x128xf32, #tpu.memory_space<vmem>>, vector<1x128xf32>
    %c11 = arith.constant 11 : index
    %c0_12 = arith.constant 0 : index
    %13 = vector.load %arg4[%c11, %c0_12] : memref<13x128xf32, #tpu.memory_space<vmem>>, vector<1x128xf32>
    %c12 = arith.constant 12 : index
    %c0_13 = arith.constant 0 : index
    %14 = vector.load %arg4[%c12, %c0_13] : memref<13x128xf32, #tpu.memory_space<vmem>>, vector<1x1xf32>
    %15 = vector.broadcast %13 : vector<1x128xf32> to vector<64x128xf32>
    %16 = arith.mulf %11, %15 : vector<64x128xf32>
    %cst_14 = arith.constant dense<0.000000e+00> : vector<64xf32>
    %17 = vector.multi_reduction <add>, %16, %cst_14 [1] : vector<64x128xf32> to vector<64xf32>
    %18 = vector.shape_cast %17 : vector<64xf32> to vector<64x1xf32>
    %19 = vector.broadcast %14 : vector<1x1xf32> to vector<64x1xf32>
    %20 = arith.addf %18, %19 : vector<64x1xf32>
    %21 = vector.broadcast %12 : vector<1x128xf32> to vector<64x128xf32>
    %22 = arith.mulf %11, %21 : vector<64x128xf32>
    %cst_15 = arith.constant dense<0.000000e+00> : vector<64xf32>
    %23 = vector.multi_reduction <add>, %22, %cst_15 [1] : vector<64x128xf32> to vector<64xf32>
    %24 = vector.shape_cast %23 : vector<64xf32> to vector<64x1xf32>
    %25 = arith.addf %24, %20 : vector<64x1xf32>
    %26 = arith.negf %25 : vector<64x1xf32>
    %27 = math.exp %26 : vector<64x1xf32>
    %cst_16 = arith.constant 1.000000e+00 : f32
    %28 = vector.broadcast %cst_16 : f32 to vector<64x1xf32>
    %29 = arith.addf %28, %27 : vector<64x1xf32>
    %30 = arith.divf %28, %29 : vector<64x1xf32>
    %31 = arith.subf %11, %11 : vector<64x128xf32>
    %32 = vector.broadcast %30 : vector<64x1xf32> to vector<64x128xf32>
    %33 = arith.mulf %32, %31 : vector<64x128xf32>
    %34 = arith.addf %11, %33 : vector<64x128xf32>
    %cst_17 = arith.constant 0.000000e+00 : f32
    %35 = vector.broadcast %cst_17 : f32 to vector<64x128xf32>
    %36 = arith.maximumf %34, %35 : vector<64x128xf32>
    %37 = arith.truncf %36 : vector<64x128xf32> to vector<64x128xbf16>
    %c1 = arith.constant 1 : index
    %c0_18 = arith.constant 0 : index
    %c0_19 = arith.constant 0 : index
    %38 = vector.load %arg3[%c1, %c0_18, %c0_19] : memref<4x128x128xbf16, #tpu.memory_space<vmem>>, vector<1x128x128xbf16>
    %39 = vector.shape_cast %38 : vector<1x128x128xbf16> to vector<128x128xbf16>
    %cst_20 = arith.constant dense<0.000000e+00> : vector<64x128xf32>
    %40 = tpu.matmul %37, %39, %cst_20 {dimension_numbers = #tpu.dot_dimension_numbers<[1], [0], [0], [1], [0, 0, 1, 1], [], []>} : vector<64x128xbf16>, vector<128x128xbf16>, vector<64x128xf32> -> vector<64x128xf32>
    %41 = arith.truncf %40 : vector<64x128xf32> to vector<64x128xbf16>
    %cst_21 = arith.constant dense<0.000000e+00> : vector<64x128xf32>
    %42 = tpu.matmul %3, %41, %cst_21 {dimension_numbers = #tpu.dot_dimension_numbers<[1], [0], [0], [1], [0, 0, 1, 1], [], []>} : vector<64x64xbf16>, vector<64x128xbf16>, vector<64x128xf32> -> vector<64x128xf32>
    %c1_22 = arith.constant 1 : index
    %c0_23 = arith.constant 0 : index
    %43 = vector.load %arg4[%c1_22, %c0_23] : memref<13x128xf32, #tpu.memory_space<vmem>>, vector<1x128xf32>
    %44 = vector.broadcast %43 : vector<1x128xf32> to vector<64x128xf32>
    %45 = arith.addf %42, %44 : vector<64x128xf32>
    %cst_24 = arith.constant dense<0.000000e+00> : vector<128xf32>
    %46 = vector.multi_reduction <add>, %45, %cst_24 [0] : vector<64x128xf32> to vector<128xf32>
    %47 = vector.shape_cast %46 : vector<128xf32> to vector<1x128xf32>
    %cst_25 = arith.constant 6.400000e+01 : f32
    %48 = vector.broadcast %cst_25 : f32 to vector<1x128xf32>
    %49 = arith.divf %47, %48 : vector<1x128xf32>
    %50 = arith.mulf %45, %45 : vector<64x128xf32>
    %cst_26 = arith.constant dense<0.000000e+00> : vector<128xf32>
    %51 = vector.multi_reduction <add>, %50, %cst_26 [0] : vector<64x128xf32> to vector<128xf32>
    %52 = vector.shape_cast %51 : vector<128xf32> to vector<1x128xf32>
    %cst_27 = arith.constant 6.400000e+01 : f32
    %53 = vector.broadcast %cst_27 : f32 to vector<1x128xf32>
    %54 = arith.divf %52, %53 : vector<1x128xf32>
    %55 = arith.mulf %49, %49 : vector<1x128xf32>
    %56 = arith.subf %54, %55 : vector<1x128xf32>
    %cst_28 = arith.constant 0.000000e+00 : f32
    %57 = vector.broadcast %cst_28 : f32 to vector<1x128xf32>
    %58 = arith.maximumf %56, %57 : vector<1x128xf32>
    %59 = vector.broadcast %49 : vector<1x128xf32> to vector<64x128xf32>
    %60 = arith.subf %45, %59 : vector<64x128xf32>
    %cst_29 = arith.constant 9.99999974E-6 : f32
    %61 = vector.broadcast %cst_29 : f32 to vector<1x128xf32>
    %62 = arith.addf %58, %61 : vector<1x128xf32>
    %63 = math.rsqrt %62 : vector<1x128xf32>
    %64 = vector.broadcast %63 : vector<1x128xf32> to vector<64x128xf32>
    %65 = arith.mulf %60, %64 : vector<64x128xf32>
    %c4 = arith.constant 4 : index
    %c0_30 = arith.constant 0 : index
    %66 = vector.load %arg4[%c4, %c0_30] : memref<13x128xf32, #tpu.memory_space<vmem>>, vector<1x128xf32>
    %67 = vector.broadcast %66 : vector<1x128xf32> to vector<64x128xf32>
    %68 = arith.mulf %65, %67 : vector<64x128xf32>
    %c7 = arith.constant 7 : index
    %c0_31 = arith.constant 0 : index
    %69 = vector.load %arg4[%c7, %c0_31] : memref<13x128xf32, #tpu.memory_space<vmem>>, vector<1x128xf32>
    %70 = vector.broadcast %69 : vector<1x128xf32> to vector<64x128xf32>
    %71 = arith.addf %68, %70 : vector<64x128xf32>
    %72 = vector.broadcast %12 : vector<1x128xf32> to vector<64x128xf32>
    %73 = arith.mulf %71, %72 : vector<64x128xf32>
    %cst_32 = arith.constant dense<0.000000e+00> : vector<64xf32>
    %74 = vector.multi_reduction <add>, %73, %cst_32 [1] : vector<64x128xf32> to vector<64xf32>
    %75 = vector.shape_cast %74 : vector<64xf32> to vector<64x1xf32>
    %76 = arith.addf %75, %20 : vector<64x1xf32>
    %77 = arith.negf %76 : vector<64x1xf32>
    %78 = math.exp %77 : vector<64x1xf32>
    %cst_33 = arith.constant 1.000000e+00 : f32
    %79 = vector.broadcast %cst_33 : f32 to vector<64x1xf32>
    %80 = arith.addf %79, %78 : vector<64x1xf32>
    %81 = arith.divf %79, %80 : vector<64x1xf32>
    %82 = arith.subf %11, %71 : vector<64x128xf32>
    %83 = vector.broadcast %81 : vector<64x1xf32> to vector<64x128xf32>
    %84 = arith.mulf %83, %82 : vector<64x128xf32>
    %85 = arith.addf %71, %84 : vector<64x128xf32>
    %cst_34 = arith.constant 0.000000e+00 : f32
    %86 = vector.broadcast %cst_34 : f32 to vector<64x128xf32>
    %87 = arith.maximumf %85, %86 : vector<64x128xf32>
    %88 = arith.truncf %87 : vector<64x128xf32> to vector<64x128xbf16>
    %c2 = arith.constant 2 : index
    %c0_35 = arith.constant 0 : index
    %c0_36 = arith.constant 0 : index
    %89 = vector.load %arg3[%c2, %c0_35, %c0_36] : memref<4x128x128xbf16, #tpu.memory_space<vmem>>, vector<1x128x128xbf16>
    %90 = vector.shape_cast %89 : vector<1x128x128xbf16> to vector<128x128xbf16>
    %cst_37 = arith.constant dense<0.000000e+00> : vector<64x128xf32>
    %91 = tpu.matmul %88, %90, %cst_37 {dimension_numbers = #tpu.dot_dimension_numbers<[1], [0], [0], [1], [0, 0, 1, 1], [], []>} : vector<64x128xbf16>, vector<128x128xbf16>, vector<64x128xf32> -> vector<64x128xf32>
    %92 = arith.truncf %91 : vector<64x128xf32> to vector<64x128xbf16>
    %cst_38 = arith.constant dense<0.000000e+00> : vector<64x128xf32>
    %93 = tpu.matmul %3, %92, %cst_38 {dimension_numbers = #tpu.dot_dimension_numbers<[1], [0], [0], [1], [0, 0, 1, 1], [], []>} : vector<64x64xbf16>, vector<64x128xbf16>, vector<64x128xf32> -> vector<64x128xf32>
    %c2_39 = arith.constant 2 : index
    %c0_40 = arith.constant 0 : index
    %94 = vector.load %arg4[%c2_39, %c0_40] : memref<13x128xf32, #tpu.memory_space<vmem>>, vector<1x128xf32>
    %95 = vector.broadcast %94 : vector<1x128xf32> to vector<64x128xf32>
    %96 = arith.addf %93, %95 : vector<64x128xf32>
    %cst_41 = arith.constant dense<0.000000e+00> : vector<128xf32>
    %97 = vector.multi_reduction <add>, %96, %cst_41 [0] : vector<64x128xf32> to vector<128xf32>
    %98 = vector.shape_cast %97 : vector<128xf32> to vector<1x128xf32>
    %cst_42 = arith.constant 6.400000e+01 : f32
    %99 = vector.broadcast %cst_42 : f32 to vector<1x128xf32>
    %100 = arith.divf %98, %99 : vector<1x128xf32>
    %101 = arith.mulf %96, %96 : vector<64x128xf32>
    %cst_43 = arith.constant dense<0.000000e+00> : vector<128xf32>
    %102 = vector.multi_reduction <add>, %101, %cst_43 [0] : vector<64x128xf32> to vector<128xf32>
    %103 = vector.shape_cast %102 : vector<128xf32> to vector<1x128xf32>
    %cst_44 = arith.constant 6.400000e+01 : f32
    %104 = vector.broadcast %cst_44 : f32 to vector<1x128xf32>
    %105 = arith.divf %103, %104 : vector<1x128xf32>
    %106 = arith.mulf %100, %100 : vector<1x128xf32>
    %107 = arith.subf %105, %106 : vector<1x128xf32>
    %cst_45 = arith.constant 0.000000e+00 : f32
    %108 = vector.broadcast %cst_45 : f32 to vector<1x128xf32>
    %109 = arith.maximumf %107, %108 : vector<1x128xf32>
    %110 = vector.broadcast %100 : vector<1x128xf32> to vector<64x128xf32>
    %111 = arith.subf %96, %110 : vector<64x128xf32>
    %cst_46 = arith.constant 9.99999974E-6 : f32
    %112 = vector.broadcast %cst_46 : f32 to vector<1x128xf32>
    %113 = arith.addf %109, %112 : vector<1x128xf32>
    %114 = math.rsqrt %113 : vector<1x128xf32>
    %115 = vector.broadcast %114 : vector<1x128xf32> to vector<64x128xf32>
    %116 = arith.mulf %111, %115 : vector<64x128xf32>
    %c5 = arith.constant 5 : index
    %c0_47 = arith.constant 0 : index
    %117 = vector.load %arg4[%c5, %c0_47] : memref<13x128xf32, #tpu.memory_space<vmem>>, vector<1x128xf32>
    %118 = vector.broadcast %117 : vector<1x128xf32> to vector<64x128xf32>
    %119 = arith.mulf %116, %118 : vector<64x128xf32>
    %c8 = arith.constant 8 : index
    %c0_48 = arith.constant 0 : index
    %120 = vector.load %arg4[%c8, %c0_48] : memref<13x128xf32, #tpu.memory_space<vmem>>, vector<1x128xf32>
    %121 = vector.broadcast %120 : vector<1x128xf32> to vector<64x128xf32>
    %122 = arith.addf %119, %121 : vector<64x128xf32>
    %123 = vector.broadcast %12 : vector<1x128xf32> to vector<64x128xf32>
    %124 = arith.mulf %122, %123 : vector<64x128xf32>
    %cst_49 = arith.constant dense<0.000000e+00> : vector<64xf32>
    %125 = vector.multi_reduction <add>, %124, %cst_49 [1] : vector<64x128xf32> to vector<64xf32>
    %126 = vector.shape_cast %125 : vector<64xf32> to vector<64x1xf32>
    %127 = arith.addf %126, %20 : vector<64x1xf32>
    %128 = arith.negf %127 : vector<64x1xf32>
    %129 = math.exp %128 : vector<64x1xf32>
    %cst_50 = arith.constant 1.000000e+00 : f32
    %130 = vector.broadcast %cst_50 : f32 to vector<64x1xf32>
    %131 = arith.addf %130, %129 : vector<64x1xf32>
    %132 = arith.divf %130, %131 : vector<64x1xf32>
    %133 = arith.subf %11, %122 : vector<64x128xf32>
    %134 = vector.broadcast %132 : vector<64x1xf32> to vector<64x128xf32>
    %135 = arith.mulf %134, %133 : vector<64x128xf32>
    %136 = arith.addf %122, %135 : vector<64x128xf32>
    %cst_51 = arith.constant 0.000000e+00 : f32
    %137 = vector.broadcast %cst_51 : f32 to vector<64x128xf32>
    %138 = arith.maximumf %136, %137 : vector<64x128xf32>
    %139 = arith.truncf %138 : vector<64x128xf32> to vector<64x128xbf16>
    %c3 = arith.constant 3 : index
    %c0_52 = arith.constant 0 : index
    %c0_53 = arith.constant 0 : index
    %140 = vector.load %arg3[%c3, %c0_52, %c0_53] : memref<4x128x128xbf16, #tpu.memory_space<vmem>>, vector<1x128x128xbf16>
    %141 = vector.shape_cast %140 : vector<1x128x128xbf16> to vector<128x128xbf16>
    %cst_54 = arith.constant dense<0.000000e+00> : vector<64x128xf32>
    %142 = tpu.matmul %139, %141, %cst_54 {dimension_numbers = #tpu.dot_dimension_numbers<[1], [0], [0], [1], [0, 0, 1, 1], [], []>} : vector<64x128xbf16>, vector<128x128xbf16>, vector<64x128xf32> -> vector<64x128xf32>
    %143 = arith.truncf %142 : vector<64x128xf32> to vector<64x128xbf16>
    %cst_55 = arith.constant dense<0.000000e+00> : vector<64x128xf32>
    %144 = tpu.matmul %3, %143, %cst_55 {dimension_numbers = #tpu.dot_dimension_numbers<[1], [0], [0], [1], [0, 0, 1, 1], [], []>} : vector<64x64xbf16>, vector<64x128xbf16>, vector<64x128xf32> -> vector<64x128xf32>
    %c3_56 = arith.constant 3 : index
    %c0_57 = arith.constant 0 : index
    %145 = vector.load %arg4[%c3_56, %c0_57] : memref<13x128xf32, #tpu.memory_space<vmem>>, vector<1x128xf32>
    %146 = vector.broadcast %145 : vector<1x128xf32> to vector<64x128xf32>
    %147 = arith.addf %144, %146 : vector<64x128xf32>
    %cst_58 = arith.constant dense<0.000000e+00> : vector<128xf32>
    %148 = vector.multi_reduction <add>, %147, %cst_58 [0] : vector<64x128xf32> to vector<128xf32>
    %149 = vector.shape_cast %148 : vector<128xf32> to vector<1x128xf32>
    %cst_59 = arith.constant 6.400000e+01 : f32
    %150 = vector.broadcast %cst_59 : f32 to vector<1x128xf32>
    %151 = arith.divf %149, %150 : vector<1x128xf32>
    %152 = arith.mulf %147, %147 : vector<64x128xf32>
    %cst_60 = arith.constant dense<0.000000e+00> : vector<128xf32>
    %153 = vector.multi_reduction <add>, %152, %cst_60 [0] : vector<64x128xf32> to vector<128xf32>
    %154 = vector.shape_cast %153 : vector<128xf32> to vector<1x128xf32>
    %cst_61 = arith.constant 6.400000e+01 : f32
    %155 = vector.broadcast %cst_61 : f32 to vector<1x128xf32>
    %156 = arith.divf %154, %155 : vector<1x128xf32>
    %157 = arith.mulf %151, %151 : vector<1x128xf32>
    %158 = arith.subf %156, %157 : vector<1x128xf32>
    %cst_62 = arith.constant 0.000000e+00 : f32
    %159 = vector.broadcast %cst_62 : f32 to vector<1x128xf32>
    %160 = arith.maximumf %158, %159 : vector<1x128xf32>
    %161 = vector.broadcast %151 : vector<1x128xf32> to vector<64x128xf32>
    %162 = arith.subf %147, %161 : vector<64x128xf32>
    %cst_63 = arith.constant 9.99999974E-6 : f32
    %163 = vector.broadcast %cst_63 : f32 to vector<1x128xf32>
    %164 = arith.addf %160, %163 : vector<1x128xf32>
    %165 = math.rsqrt %164 : vector<1x128xf32>
    %166 = vector.broadcast %165 : vector<1x128xf32> to vector<64x128xf32>
    %167 = arith.mulf %162, %166 : vector<64x128xf32>
    %c6 = arith.constant 6 : index
    %c0_64 = arith.constant 0 : index
    %168 = vector.load %arg4[%c6, %c0_64] : memref<13x128xf32, #tpu.memory_space<vmem>>, vector<1x128xf32>
    %169 = vector.broadcast %168 : vector<1x128xf32> to vector<64x128xf32>
    %170 = arith.mulf %167, %169 : vector<64x128xf32>
    %c9 = arith.constant 9 : index
    %c0_65 = arith.constant 0 : index
    %171 = vector.load %arg4[%c9, %c0_65] : memref<13x128xf32, #tpu.memory_space<vmem>>, vector<1x128xf32>
    %172 = vector.broadcast %171 : vector<1x128xf32> to vector<64x128xf32>
    %173 = arith.addf %170, %172 : vector<64x128xf32>
    %c0_66 = arith.constant 0 : index
    %c0_67 = arith.constant 0 : index
    %c0_68 = arith.constant 0 : index
    %174 = vector.load %arg5[%c0_66, %c0_67, %c0_68] : memref<1x64x128xf32, #tpu.memory_space<vmem>>, vector<1x64x128xf32>
    %175 = vector.shape_cast %174 : vector<1x64x128xf32> to vector<64x128xf32>
    %176 = vector.shape_cast %173 : vector<64x128xf32> to vector<1x64x128xf32>
    tpu.vector_store %arg5[%c0_66, %c0_67, %c0_68], %176 {strides = array<i32>} : memref<1x64x128xf32, #tpu.memory_space<vmem>>, vector<1x64x128xf32>,
    return
  }
  func.func @transform_0(%arg0: i32) -> (i32, i32, i32) {
    %c0_i32 = arith.constant 0 : i32
    %c0_i32_0 = arith.constant 0 : i32
    %c0_i32_1 = arith.constant 0 : i32
    return %arg0, %c0_i32, %c0_i32_0 : i32, i32, i32
  }
  func.func @transform_1(%arg0: i32) -> (i32, i32, i32) {
    %c0_i32 = arith.constant 0 : i32
    %c0_i32_0 = arith.constant 0 : i32
    %c0_i32_1 = arith.constant 0 : i32
    return %arg0, %c0_i32, %c0_i32_0 : i32, i32, i32
  }
  func.func @transform_2(%arg0: i32) -> (i32, i32, i32) {
    %c0_i32 = arith.constant 0 : i32
    %c0_i32_0 = arith.constant 0 : i32
    %c0_i32_1 = arith.constant 0 : i32
    %c0_i32_2 = arith.constant 0 : i32
    return %c0_i32, %c0_i32_0, %c0_i32_1 : i32, i32, i32
  }
  func.func @transform_3(%arg0: i32) -> (i32, i32) {
    %c0_i32 = arith.constant 0 : i32
    %c0_i32_0 = arith.constant 0 : i32
    %c0_i32_1 = arith.constant 0 : i32
    return %c0_i32, %c0_i32_0 : i32, i32
  }
  func.func @transform_4(%arg0: i32) -> (i32, i32, i32) {
    %c0_i32 = arith.constant 0 : i32
    %c0_i32_0 = arith.constant 0 : i32
    %c0_i32_1 = arith.constant 0 : i32
    return %arg0, %c0_i32, %c0_i32_0 : i32, i32, i32
  }
}

</mosaic_0001>

<bundles_post_ra>
// kernel: tpu_custom_call.1
= control target key start
LH: loop header
LB: loop body
LE: loop exit
PB: predicated region body
PF: predicated region fallthrough
CT: control target
= control target key end

     0   :  { %s3448_s0 = inlined_call_operand.hbm [shape: bf16[8,64,128], index: 0, kind: input, shape index: {}]   ;;  %s3449_s1 = inlined_call_operand.hbm [shape: bf16[8,64,64], index: 1, kind: input, shape index: {}]   ;;  %s3450_s2 = inlined_call_operand.hbm [shape: bf16[4,128,128], index: 2, kind: input, shape index: {}]   ;;  %s3451_s3 = inlined_call_operand.hbm [shape: f32[13,128], index: 3, kind: input, shape index: {}]   ;;  %s3452_s4 = inlined_call_operand.hbm [shape: f32[8,64,128], index: 4, kind: output, shape index: {}]  }
   0x1   :  { %3460 = sst [smem:[#allocation16_spill]] %s3448_s0 }
   0x2   :  { %9 = vsyncpa [#allocation3], 0 }
   0x3   :  { %11 = vsyncpa [#allocation3 + $0x1], 0 }
   0x4   :  { %12 = vsyncpa [#allocation6], 0 }
   0x5   :  { %14 = vsyncpa [#allocation6 + $0x1], 0 }
   0x6   :  { %15 = vsyncpa [#allocation9], 0 }
   0x7   :  { %16 = vsyncpa [#allocation4], 0 }
   0x8   :  { %18 = vsyncpa [#allocation4 + $0x1], 0  ;;  %s2885_s15 = smov 0   ;;  %s2887_s16 = smov 0  }
   0x9   :  { %s2889_s17 = smov 0   ;;  %s2891_s18 = smov 0  }
   0xa LB: > { %s2906_s19 = sadd.s32 4294967295, %s2846_s18   ;;  %s2076_s20 = sadd.s32 4294967294, %s2846_s18   ;;  %s2846_s18 = sphi %s2891_s18, %s3480_s18   ;;  %s2842_s17 = sphi %s2889_s17, %s3479_s17   ;;  %s2838_s16 = sphi %s2887_s16, %s3478_s16   ;;  %s2834_s15 = sphi %s2885_s15, %s3477_s15  }
   0xb   : > { %p44_p0 = scmp.ne.s32.totalorder %s2838_s16, %s2834_s15  ;;  %p3457_p1 = scmp.eq.s32.totalorder %s2906_s19, 0 }
   0xc   : > { %p136_p2 = scmp.eq.s32.totalorder %s2906_s19, 7  ;;  %p142_p3 = scmp.eq.s32.totalorder %s2076_s20, 7 }
   0xd   : > { %p2915_p4 = por %p3457_p1, %p44_p0  ;;  %p2077_p5 = scmp.ge.s32.totalorder %s2846_s18, 1 }
   0xe   : > { %p2920_p6 = por %p142_p3, %p44_p0  ;;  %p149_p7 = scmp.lt.s32.totalorder %s2846_s18, 9 }
   0xf   : > { %s3461_s21 = scalar_select %p2915_p4, 1, 0 }
  0x10   : > { %s3462_s22 = scalar_select %p2920_p6, 1, 0 }
  0x11   : > { %p2925_p8 = pnand %p2077_p5, %p149_p7  ;;  %s2848_s24 = smov [#allocation7]  }
  0x12   : > { %s161_s25 = sshll.u32 %s2848_s24, 4  ;;  %s2849_s27 = smov [#allocation8]   ;;  %s162_s25 = int_to_ptr.vmem [resolvable:$true] %s161_s25 }
  0x13   : > { %p2448_p9 = pneg %p2925_p8  ;;  %s174_s28 = sshll.u32 %s2849_s27, 4  ;;  %s175_s28 = int_to_ptr.vmem [resolvable:$true] %s174_s28 }
  0x14   : > { %s2673_s29 = scalar_lea.vmem %s162_s25, 4096  ;;  %p2681_p3 = scmp.lt.s32.totalorder %s162_s25, %s162_s25 }
  0x15   : > { %p2933_p10 = pnand %p2448_p9, %p3457_p1  ;;  %p2674_p12 = scmp.ne.s32.totalorder %s162_s25, %s2673_s29 }
  0x16   : > { %p2682_p5 = scmp.lt.s32.totalorder %s2673_s29, %s2673_s29 }
  0x17   : > { %p2664_p11 = pneg %p2933_p10 }
  0x18   : > { %p2683_p7 = por %p2682_p5, %p2681_p3 }
  0x19   : > { %p2676_p13 = pnand %p2674_p12, %p2664_p11 }
  0x1b   : > { %p2677_p0 = pneg %p2676_p13 }
  0x1d   : > { %p2684_p9 = pnand %p2683_p7, %p2677_p0 }
  0x1f   : > { %2687 = shalt.err (!%p2684_p9)
}
  0x20   : > { %s3453_s30 = smov 64   ;;  %s3455_s5 = smov 4  }
  0x21   : > { %2451 = dma.hbm_to_vmem [thread:$0]  (!%p2933_p10), %s3450_s2, 4096, %s162_s25, [#allocation6], %s3453_s30, %s3453_s30, %s3455_s5  }
  0x22   : > { %s2699_s8 = scalar_lea.vmem %s175_s28, 256  ;;  %p2707_p0 = scmp.lt.s32.totalorder %s175_s28, %s175_s28 }
  0x23   : > { %p2700_p12 = scmp.ne.s32.totalorder %s175_s28, %s2699_s8  ;;  %p2708_p5 = scmp.lt.s32.totalorder %s2699_s8, %s2699_s8 }
  0x25   : > { %p2702_p13 = pnand %p2700_p12, %p2664_p11  ;;  %p2709_p7 = por %p2708_p5, %p2707_p0 }
  0x27   : > { %p2703_p3 = pneg %p2702_p13 }
  0x29   : > { %p2710_p9 = pnand %p2709_p7, %p2703_p3 }
  0x2b   : > { %2713 = shalt.err (!%p2710_p9)
}
  0x2c   : > { %s2852_s9 = smov 128   ;;  %s2853_s10 = smov 8  }
  0x2d   : > { %2454 = dma.hbm_to_vmem [thread:$0]  (!%p2933_p10), %s3451_s3, 256, %s175_s28, [#allocation9], %s2852_s9, %s2852_s9, %s2853_s10  }
  0x2e   : > { %s2959_s13 = sadd.s32 1, %s2846_s18   ;;  %s31_s20 = sadd.s32 1, %s2842_s17 }
  0x2f   : > { %s28_s14 = ssub.s32 %s2846_s18, %s2959_s13  ;;  %p38_p12 = scmp.ne.s32.totalorder %s2842_s17, %s2838_s16 }
  0x30   : > { %p29_p11 = scmp.eq.s32.totalorder %s28_s14, 0  ;;  %p39_p13 = scmp.eq.s32.totalorder %s2846_s18, 0 }
  0x31   : > { %p2972_p0 = por %p136_p2, %p38_p12  ;;  %p2468_p5 = scmp.lt.s32.totalorder %s2846_s18, 8 }
  0x32   : > { %s2968_s24 = scalar_select %p29_p11, %s2842_s17, %s31_s20  }
  0x33   : > { %p40_p3 = por %p39_p13, %p38_p12  ;;  %s188_s26 = sand.u32 1, %s2842_s17  }
  0x34   : > { %s3465_s25 = scalar_select %p2972_p0, 1, 0 }
  0x35   : > { %s2081_s27 = sshll.u32 %s188_s26, 5  ;;  %s2191_s28 = sshll.u32 %s2846_s18, 9 }
  0x36   : > { %s3466_s0 = sld [smem:[#allocation16_spill]]  ;;  %s192_s8 = scalar_lea.vmem [#allocation2], %s2081_s27 }
  0x37   : > { %s199_s9 = sshll.u32 %s192_s8, 4  ;;  %p2986_p2 = pnand %p2468_p5, %p40_p3  ;;  %s2984_s9 = int_to_ptr.vmem [resolvable:$true] %s199_s9 }
  0x38   : > { %s2993_s14 = scalar_lea.hbm %s3449_s1, %s2191_s28  ;;  %s213_s20 = scalar_lea.vmem [#allocation5], %s2081_s27 }
  0x39   : > { %s2995_s29 = sshll.u32 %s213_s20, 4  ;;  %s2997_s6 = scalar_lea.sflag [#allocation3], %s188_s26  ;;  %s3028_s29 = int_to_ptr.vmem [resolvable:$true] %s2995_s29 }
  0x3a   : > { %p2716_p7 = pneg %p2986_p2 }
  0x3c   : > { %s2982_s7 = scalar_lea.hbm %s3466_s0, %s2191_s28  ;;  %s2719_s11 = scalar_lea.hbm %s3466_s0, 4096 }
  0x3d   : > { %s2714_s30 = scalar_lea.hbm %s2982_s7, 512  ;;  %p2720_p12 = scmp.lt.s32.totalorder %s2982_s7, %s3466_s0 }
  0x3e   : > { %p2715_p10 = scmp.ne.s32.totalorder %s2982_s7, %s2714_s30  ;;  %p2721_p13 = scmp.lt.s32.totalorder %s2719_s11, %s2714_s30 }
  0x40   : > { %p2717_p9 = pnand %p2716_p7, %p2715_p10  ;;  %p2722_p3 = por %p2721_p13, %p2720_p12 }
  0x42   : > { %p2718_p11 = pneg %p2717_p9 }
  0x44   : > { %p2723_p5 = pnand %p2722_p3, %p2718_p11 }
  0x46   : > { %2726 = shalt.err (!%p2723_p5)
}
  0x47   : > { %s2727_s26 = scalar_lea.vmem %s2984_s9, 512  ;;  %s2854_s5 = smov [#allocation2]  }
  0x48   : > { %p2728_p1 = scmp.ne.s32.totalorder %s2984_s9, %s2727_s26  ;;  %s2732_s27 = sshll.u32 %s2854_s5, 4  ;;  %s2733_s27 = int_to_ptr.vmem [resolvable:$false] %s2732_s27 }
  0x49   : > { %s2734_s20 = scalar_lea.vmem %s2733_s27, 1024  ;;  %p2735_p6 = scmp.lt.s32.totalorder %s2984_s9, %s2733_s27 }
  0x4a   : > { %p2730_p10 = pnand %p2728_p1, %p2716_p7  ;;  %p2736_p0 = scmp.lt.s32.totalorder %s2734_s20, %s2727_s26 }
  0x4c   : > { %p2731_p9 = pneg %p2730_p10  ;;  %p2737_p4 = por %p2736_p0, %p2735_p6 }
  0x4e   : > { %p2738_p12 = pnand %p2737_p4, %p2731_p9 }
  0x50   : > { %2741 = shalt.err (!%p2738_p12)
}
  0x51   : > { %s3468_s30 = smov 4   ;;  %s3469_s8 = smov 64  }
  0x52   : > { %2458 = dma.hbm_to_vmem [thread:$0]  (!%p2986_p2), %s2982_s7, 512, %s2984_s9, %s2997_s6, %s3469_s8, %s3469_s8, %s3468_s30  }
  0x53   : > { %s209_s11 = sand.u32 1, %s2846_s18   ;;  %s2742_s28 = scalar_lea.hbm %s2993_s14, 512 }
  0x54   : > { %s210_s12 = scalar_lea.sflag [#allocation6], %s209_s11  ;;  %p2743_p1 = scmp.ne.s32.totalorder %s2993_s14, %s2742_s28 }
  0x55   : > { %s2747_s27 = scalar_lea.hbm %s3449_s1, 4096  ;;  %p2748_p0 = scmp.lt.s32.totalorder %s2993_s14, %s3449_s1 }
  0x56   : > { %p2745_p4 = pnand %p2743_p1, %p2716_p7  ;;  %p2749_p11 = scmp.lt.s32.totalorder %s2747_s27, %s2742_s28 }
  0x58   : > { %p2746_p6 = pneg %p2745_p4  ;;  %p2750_p13 = por %p2749_p11, %p2748_p0 }
  0x5a   : > { %p2751_p3 = pnand %p2750_p13, %p2746_p6 }
  0x5c   : > { %2754 = shalt.err (!%p2751_p3)
}
  0x5d   : > { %s2755_s7 = scalar_lea.vmem %s3028_s29, 512  ;;  %s2855_s9 = smov [#allocation5]  }
  0x5e   : > { %p2756_p5 = scmp.ne.s32.totalorder %s3028_s29, %s2755_s7  ;;  %s2760_s6 = sshll.u32 %s2855_s9, 4  ;;  %s2761_s6 = int_to_ptr.vmem [resolvable:$false] %s2760_s6 }
  0x5f   : > { %s2762_s11 = scalar_lea.vmem %s2761_s6, 1024  ;;  %p2763_p12 = scmp.lt.s32.totalorder %s3028_s29, %s2761_s6 }
  0x60   : > { %p2758_p10 = pnand %p2756_p5, %p2716_p7  ;;  %p2764_p1 = scmp.lt.s32.totalorder %s2762_s11, %s2755_s7 }
  0x62   : > { %p2759_p9 = pneg %p2758_p10  ;;  %p2765_p4 = por %p2764_p1, %p2763_p12 }
  0x64   : > { %p2766_p0 = pnand %p2765_p4, %p2759_p9 }
  0x66   : > { %2769 = shalt.err (!%p2766_p0)
}
  0x67   : > { %2461 = dma.hbm_to_vmem [thread:$0]  (!%p2986_p2), %s2993_s14, 512, %s3028_s29, %s210_s12, %s3469_s8, %s3469_s8, %s3468_s30  }
  0x68   : > { %232 = sbr.rel (%p2925_p8) target bundleno = 2989 (0xbad), region = 36  ;;  %s3059_s0 = sand.u32 (!%p2925_p8), 1, %s2838_s16  }
  0x69   : > { %s2088_s28 = sshll.u32 (!%p2925_p8), %s3059_s0, 5  ;;  %s235_s26 = scalar_lea.sflag (!%p2925_p8), [#allocation3], %s3059_s0 }
  0x6a   : > { %s3063_s5 = scalar_lea.vmem (!%p2925_p8), [#allocation2], %s2088_s28  ;;  %p3470_p7 = scmp.ne.s32.totalorder (!%p2925_p8), %s3461_s21, 0 }
  0x6d   : > { %2813 = dma.done.wait (%p3470_p7), %s235_s26, 512  }
  0x6e   : > { %2815 = vsyncadd (%p3470_p7), %s235_s26, 4294966784  ;;  %s243_s10 = sand.u32 1, %s2906_s19   ;;  %s3070_s14 = scalar_lea.vmem [#allocation5], %s2088_s28 }
  0x6f   : > { %s244_s23 = scalar_lea.sflag [#allocation6], %s243_s10 }
  0x70   : > { %2817 = dma.done.wait (%p3470_p7), %s244_s23, 512  }
  0x71   : > { %2819 = vsyncadd (%p3470_p7), %s244_s23, 4294966784  ;;  %p3471_p8 = scmp.eq.s32.totalorder %s2906_s19, 0 }
  0x73   : > { %2821 = dma.done.wait (%p3471_p8), [#allocation6], 4096   ;;  %p3472_p2 = pmov %p3471_p8 }
  0x75   : > { %2823 = vsyncadd (%p3472_p2), [#allocation6], 4294963200  ;;  %p3473_p6 = pmov %p3472_p2 }
  0x76   : > { %p3474_p11 = pmov %p3472_p2 }
  0x77   : > { %2825 = dma.done.wait (%p3473_p6), [#allocation9], 256  }
  0x78   : > { %2827 = vsyncadd (%p3474_p11), [#allocation9], 4294967040  ;;  %v2515_v0 = vld [vmem:[#allocation7 + $0x38] sm:$0xff]   ;;  %v2516_v1 = vld [vmem:[#allocation7 + $0x30] sm:$0xff]   ;;  %vm484_vm0 = vcmask 523264   ;;  %v2856_v63 = vmov 0  }
  0x79   : > { %2274 = vmatprep.subr.bf16.mxu0 %v2515_v0  ;;  %v2517_v2 = vld [vmem:[#allocation7 + $0x28] sm:$0xff]   ;;  %v2518_v3 = vld [vmem:[#allocation7 + $0x20] sm:$0xff]   ;;  %v2519_v5 = vld [vmem:[#allocation7 + $0x18] sm:$0xff]   ;;  %2514 = vset.pattern.permute.xlu1 %v2856_v63  ;;  %s2092_s21 = sshll.u32 %s3059_s0, 6  ;;  %s2193_s29 = sshll.u32 %s2906_s19, 10 }
  0x7a   : > { %2275 = vmatpush3.bf16.msra.mxu0 %v2515_v0  ;;  %v2523_v4 = vld [vmem:[%s3063_s5] sm:$0xff]   ;;  %v2520_v6 = vld [vmem:[#allocation7 + $0x10] sm:$0xff]   ;;  %v2521_v7 = vld [vmem:[#allocation7 + $0x8] sm:$0xff]   ;;  %2513 = vset.pattern.permute.xlu0 %v2856_v63  ;;  %s284_s30 = scalar_lea.vmem [#allocation10], %s2092_s21  ;;  %s3404_s20 = scalar_lea.hbm %s3452_s4, %s2193_s29 }
  0x7b   : > { %2276 = vmatprep.subr.bf16.mxu0 %v2516_v1  ;;  %2290 = vmatprep.mubr.bf16.mxu0 %v2523_v4  ;;  %v2522_v8 = vld [vmem:[#allocation7] sm:$0xff]   ;;  %v2524_v9 = vld [vmem:[%s3063_s5 + $0x8] sm:$0xff]   ;;  %v2525_v10 = vld [vmem:[%s3063_s5 + $0x10] sm:$0xff]   ;;  %s1961_s8 = sshll.u32 %s284_s30, 4  ;;  %s1948_s19 = scalar_lea.sflag [#allocation4], %s3059_s0  ;;  %s3406_s8 = int_to_ptr.vmem [resolvable:$true] %s1961_s8 }
  0x7c   : > { %v2526_v11 = vld [vmem:[%s3063_s5 + $0x18] sm:$0xff]   ;;  %v3089_v12 = vld [vmem:[%s3070_s14] sm:$0xff]   ;;  %v3096_v25 = vld [vmem:[%s3070_s14 + $0x8] sm:$0xff]   ;;  %s2770_s7 = scalar_lea.vmem %s3406_s8, 1024  ;;  %p3475_p3 = scmp.ne.s32.totalorder %s3465_s25, 0 }
  0x7d   : > { %2306 = vmatprep.mubr.msk.bf16.mxu1 %vm484_vm0, %v3089_v12  ;;  %v3099_v26 = vld [vmem:[%s3070_s14 + $0x10] sm:$0xff]   ;;  %v3106_v27 = vld [vmem:[%s3070_s14 + $0x18] sm:$0xff]   ;;  %v2105_v28 = vld [vmem:[#allocation8] ss:$0 sm:$0xff]  ;;  %p2771_p13 = scmp.ne.s32.totalorder %s3406_s8, %s2770_s7  ;;  %s2857_s9 = smov [#allocation10]  }
  0x7e   : > { %2277 = vmatpush3.bf16.msra.mxu0 %v2516_v1  ;;  %v3110_v30 = vld [vmem:[#allocation8 + $0xa] ss:$0 sm:$0xff]  ;;  %v2114_v31 = vld [vmem:[#allocation8 + $0xb] ss:$0 sm:$0xff]  ;;  %v2531_v0 = vld [vmem:[#allocation7 + $0x78] sm:$0xff]   ;;  %s2774_s6 = sshll.u32 %s2857_s9, 4  ;;  %s2775_s6 = int_to_ptr.vmem [resolvable:$false] %s2774_s6 }
  0x7f   : > { %2278 = vmatprep.subr.bf16.mxu0 %v2517_v2  ;;  %v2532_v1 = vld [vmem:[#allocation7 + $0x70] sm:$0xff]   ;;  %p2772_p5 = pnand %p2771_p13, %p3475_p3  ;;  %s2776_s11 = scalar_lea.vmem %s2775_s6, 2048 }
  0x80   : > { %p2777_p9 = scmp.lt.s32.totalorder %s3406_s8, %s2775_s6  ;;  %p2778_p12 = scmp.lt.s32.totalorder %s2776_s11, %s2770_s7 }
  0x81   : > { %p2773_p10 = pneg %p2772_p5 }
  0x82   : > { %2279 = vmatpush3.bf16.msra.mxu0 %v2517_v2  ;;  %v2533_v2 = vld [vmem:[#allocation7 + $0x68] sm:$0xff]   ;;  %p2779_p1 = por %p2778_p12, %p2777_p9 }
  0x83   : > { %2280 = vmatprep.subr.bf16.mxu0 %v2518_v3 }
  0x84   : > { %p2780_p4 = pnand %p2779_p1, %p2773_p10 }
  0x86   : > { %2281 = vmatpush3.bf16.msra.mxu0 %v2518_v3  ;;  %v2115_v3 = vld [vmem:[#allocation8 + $0xc] ss:$0 sm:$0xff] }
  0x87   : > { %2282 = vmatprep.subr.bf16.mxu0 %v2519_v5 }
  0x8a   : > { %2283 = vmatpush3.bf16.msra.mxu0 %v2519_v5 }
  0x8b   : > { %2284 = vmatprep.subr.bf16.mxu0 %v2520_v6 }
  0x8e   : > { %2285 = vmatpush3.bf16.msra.mxu0 %v2520_v6 }
  0x8f   : > { %2286 = vmatprep.subr.bf16.mxu0 %v2521_v7 }
  0x92   : > { %2287 = vmatpush3.bf16.msra.mxu0 %v2521_v7 }
  0x93   : > { %2288 = vmatprep.subr.bf16.mxu0 %v2522_v8 }
  0x96   : > { %2289 = vmatpush3.bf16.msra.mxu0 %v2522_v8 }
  0x99   : > { %2291 = vmatmul.mubr.bf16.vlgmr.msra.gmra.mxu0 %v2524_v9 }
  0x9a   : > { %2294 = vmatprep.mubr.bf16.mxu0 %v2525_v10 }
  0xa1   : > { %2295 = vmatmul.mubr.bf16.gmra.mxu0 %v2526_v11 }
  0xa2   : > { %2346 = vmatprep.mubr.msk.bf16.mxu0 %vm484_vm0, %v3089_v12 }
 0x159   : > { %v2292_v13 = vpop.f32.mrf.mxu0 }
 0x15b   : > { %v424_v14 = vpop.f32.mrf.mxu0 }
 0x15d   : > { %v2293_v15 = vpop.f32.mrf.mxu0 }
 0x15e   : > { %v456_v23 = vpack.c.bf16 %v2293_v15, %v2292_v13 }
 0x15f   : > { %v427_v16 = vpop.f32.mrf.mxu0 }
 0x160   : > { %v455_v24 = vpack.c.bf16 %v427_v16, %v424_v14 }
 0x161   : > { %v2296_v17 = vpop.f32.mrf.mxu0 }
 0x163   : > { %v440_v18 = vpop.f32.mrf.mxu0 }
 0x165   : > { %v2297_v19 = vpop.f32.mrf.mxu0 }
 0x166   : > { %v458_v20 = vpack.c.bf16 %v2297_v19, %v2296_v17 }
 0x167   : > { %v443_v21 = vpop.f32.mrf.mxu0 }
 0x168   : > { %v457_v22 = vpack.c.bf16 %v443_v21, %v440_v18  ;;  %2298 = vmatprep.subr.bf16.mxu1 %v458_v20 }
 0x169   : > { %2299 = vmatpush3.bf16.msra.mxu1 %v458_v20 }
 0x16a   : > { %2300 = vmatprep.subr.bf16.mxu1 %v457_v22 }
 0x16d   : > { %2301 = vmatpush3.bf16.msra.mxu1 %v457_v22 }
 0x16e   : > { %2302 = vmatprep.subr.bf16.mxu1 %v456_v23 }
 0x171   : > { %2303 = vmatpush3.bf16.msra.mxu1 %v456_v23 }
 0x172   : > { %2304 = vmatprep.subr.bf16.mxu1 %v455_v24 }
 0x175   : > { %2305 = vmatpush3.bf16.msra.mxu1 %v455_v24 }
 0x176   : > { %2314 = vmatprep.subr.bf16.mxu1 %v2531_v0 }
 0x178   : > { %2307 = vmatmul.mubr.msk.bf16.vlgmr.msra.gmra.mxu1 %vm484_vm0, %v3096_v25 }
 0x179   : > { %2310 = vmatprep.mubr.msk.bf16.mxu1 %vm484_vm0, %v3099_v26  ;;  %2315 = vmatpush3.bf16.msra.mxu1 %v2531_v0  ;;  %v2534_v0 = vld [vmem:[#allocation7 + $0x60] sm:$0xff]  }
 0x17a   : > { %2316 = vmatprep.subr.bf16.mxu1 %v2532_v1 }
 0x17d   : > { %2317 = vmatpush3.bf16.msra.mxu1 %v2532_v1 }
 0x17e   : > { %2318 = vmatprep.subr.bf16.mxu1 %v2533_v2 }
 0x180   : > { %2311 = vmatmul.mubr.msk.bf16.gmra.mxu1 %vm484_vm0, %v3106_v27 }
 0x181   : > { %2319 = vmatpush3.bf16.msra.mxu1 %v2533_v2  ;;  %v2535_v2 = vld [vmem:[#allocation7 + $0x58] sm:$0xff]  }
 0x182   : > { %2320 = vmatprep.subr.bf16.mxu1 %v2534_v0 }
 0x185   : > { %2321 = vmatpush3.bf16.msra.mxu1 %v2534_v0 }
 0x186   : > { %2322 = vmatprep.subr.bf16.mxu1 %v2535_v2 }
 0x189   : > { %2323 = vmatpush3.bf16.msra.mxu1 %v2535_v2 }
 0x238   : > { %v2308_v29 = vpop.f32.mrf.mxu1 }
 0x239   : > { %v3112_v32 = vadd.f32 %v2308_v29, %v2105_v28 }
 0x23a   : > { %v531_v33 = vpop.f32.mrf.mxu1 }
 0x23b   : > { %v3114_v34 = vadd.f32 %v2105_v28, %v531_v33  ;;  %v611_v35 = vmul.f32 %v3110_v30, %v3112_v32  ;;  %v571_v36 = vmul.f32 %v2114_v31, %v3112_v32 }
 0x23c   : > { %v2309_v37 = vpop.f32.mrf.mxu1 }
 0x23d   : > { %v3119_v38 = vadd.f32 %v2309_v37, %v2105_v28  ;;  %621 = vadd.xlane.f32.xlu0 %v611_v35  ;;  %581 = vadd.xlane.f32.xlu1 %v571_v36  ;;  %v569_v41 = vmul.f32 %v2114_v31, %v3114_v34  ;;  %v609_v46 = vmul.f32 %v3110_v30, %v3114_v34 }
 0x23e   : > { %v534_v39 = vpop.f32.mrf.mxu1 }
 0x23f   : > { %v572_v40 = vmul.f32 %v2114_v31, %v3119_v38  ;;  %v3123_v44 = vadd.f32 %v2105_v28, %v534_v39  ;;  %v612_v45 = vmul.f32 %v3110_v30, %v3119_v38 }
 0x240   : > { %v2312_v42 = vpop.f32.mrf.mxu1 }
 0x241   : > { %583 = vadd.xlane.f32.xlu1 %v572_v40  ;;  %577 = vadd.xlane.f32.xlu0 %v569_v41  ;;  %v3129_v48 = vadd.f32 %v2312_v42, %v2105_v28  ;;  %v610_v50 = vmul.f32 %v3110_v30, %v3123_v44  ;;  %v570_v51 = vmul.f32 %v2114_v31, %v3123_v44 }
 0x242   : > { %v547_v43 = vpop.f32.mrf.mxu1 }
 0x243   : > { %v575_v54 = vmul.f32 %v2114_v31, %v3129_v48  ;;  %v3138_v55 = vadd.f32 %v2105_v28, %v547_v43  ;;  %v615_v62 = vmul.f32 %v3110_v30, %v3129_v48 }
 0x244   : > { %v2313_v47 = vpop.f32.mrf.mxu1 }
 0x245   : > { %623 = vadd.xlane.f32.xlu1 %v612_v45  ;;  %617 = vadd.xlane.f32.xlu0 %v609_v46  ;;  %v3131_v49 = vadd.f32 %v2313_v47, %v2105_v28  ;;  %v573_v58 = vmul.f32 %v2114_v31, %v3138_v55  ;;  %v613_v60 = vmul.f32 %v3110_v30, %v3138_v55 }
 0x246   : > { %v550_v52 = vpop.f32.mrf.mxu1  ;;  %v693_v2 = vsub.f32 %v3138_v55, %v3138_v55 }
 0x247   : > { %v576_v53 = vmul.f32 %v2114_v31, %v3131_v49  ;;  %v3140_v56 = vadd.f32 %v2105_v28, %v550_v52  ;;  %v616_v61 = vmul.f32 %v3110_v30, %v3131_v49 }
 0x249   : > { %619 = vadd.xlane.f32.xlu1 %v610_v50  ;;  %579 = vadd.xlane.f32.xlu0 %v570_v51  ;;  %v574_v57 = vmul.f32 %v2114_v31, %v3140_v56  ;;  %v614_v59 = vmul.f32 %v3110_v30, %v3140_v56 }
 0x24d   : > { %591 = vadd.xlane.f32.xlu1 %v576_v53  ;;  %589 = vadd.xlane.f32.xlu0 %v575_v54 }
 0x251   : > { %587 = vadd.xlane.f32.xlu1 %v574_v57  ;;  %585 = vadd.xlane.f32.xlu0 %v573_v58 }
 0x255   : > { %627 = vadd.xlane.f32.xlu1 %v614_v59  ;;  %625 = vadd.xlane.f32.xlu0 %v613_v60 }
 0x259   : > { %631 = vadd.xlane.f32.xlu1 %v616_v61  ;;  %629 = vadd.xlane.f32.xlu0 %v615_v62 }
 0x2c6   : > { %v622_v4 = vpop.xlane.xlu0 %621  ;;  %v582_v5 = vpop.xlane.xlu1 %581 }
 0x2c7   : > { %v3152_v6 = vadd.f32 %v2115_v3, %v582_v5 }
 0x2c9   : > { %v635_v7 = vadd.f32 %v622_v4, %v3152_v6 }
 0x2ca   : > { %v584_v8 = vpop.xlane.xlu1 %583  ;;  %v578_v9 = vpop.xlane.xlu0 %577 }
 0x2cb   : > { %v2119_v10 = vmul.f32 -1.442695, %v635_v7  ;;  %v3155_v11 = vadd.f32 %v2115_v3, %v584_v8  ;;  %v3157_v13 = vadd.f32 %v2115_v3, %v578_v9  ;;  %v2536_v7 = vld [vmem:[#allocation7 + $0x50] sm:$0xff]  }
 0x2cc   : > { %2324 = vmatprep.subr.bf16.mxu1 %v2536_v7 }
 0x2cd   : > { %2555 = vpow2.f32 %v2119_v10  ;;  %2325 = vmatpush3.bf16.msra.mxu1 %v2536_v7  ;;  %v2537_v10 = vld [vmem:[#allocation7 + $0x48] sm:$0xff]   ;;  %v694_v7 = vsub.f32 %v3140_v56, %v3140_v56 }
 0x2ce   : > { %v624_v14 = vpop.xlane.xlu1 %623  ;;  %v618_v15 = vpop.xlane.xlu0 %617  ;;  %2326 = vmatprep.subr.bf16.mxu1 %v2537_v10 }
 0x2cf   : > { %v636_v16 = vadd.f32 %v624_v14, %v3155_v11  ;;  %v633_v17 = vadd.f32 %v618_v15, %v3157_v13 }
 0x2d1   : > { %v2120_v18 = vmul.f32 -1.442695, %v636_v16  ;;  %v2117_v19 = vmul.f32 -1.442695, %v633_v17  ;;  %v2538_v16 = vld [vmem:[#allocation7 + $0x40] sm:$0xff]   ;;  %2327 = vmatpush3.bf16.msra.mxu1 %v2537_v10 }
 0x2d2   : > { %v620_v20 = vpop.xlane.xlu1 %619  ;;  %v580_v21 = vpop.xlane.xlu0 %579  ;;  %2328 = vmatprep.subr.bf16.mxu1 %v2538_v16 }
 0x2d3   : > { %2557 = vpow2.f32 %v2120_v18  ;;  %v3161_v22 = vadd.f32 %v2115_v3, %v580_v21 }
 0x2d4   : > { %2559 = vpow2.f32 %v2117_v19 }
 0x2d5   : > { %v634_v23 = vadd.f32 %v620_v20, %v3161_v22  ;;  %2329 = vmatpush3.bf16.msra.mxu1 %v2538_v16  ;;  %v696_v16 = vsub.f32 %v3131_v49, %v3131_v49 }
 0x2d6   : > { %v592_v24 = vpop.xlane.xlu1 %591  ;;  %v590_v28 = vpop.xlane.xlu0 %589 }
 0x2d7   : > { %v2118_v29 = vmul.f32 -1.442695, %v634_v23  ;;  %v3167_v46 = vadd.f32 %v2115_v3, %v590_v28  ;;  %v3173_v60 = vadd.f32 %v2115_v3, %v592_v24 }
 0x2d9   : > { %2561 = vpow2.f32 %v2118_v29 }
 0x2da   : > { %v2556_v31 = vpop.eup %2555  ;;  %v588_v33 = vpop.xlane.xlu1 %587 }
 0x2db   : > { %v586_v35 = vpop.xlane.xlu0 %585  ;;  %v667_v36 = vadd.f32 1.0, %v2556_v31  ;;  %v3169_v50 = vadd.f32 %v2115_v3, %v588_v33  ;;  %v692_v33 = vsub.f32 %v3119_v38, %v3119_v38 }
 0x2dc   : > { %v3164_v37 = vadd.f32 %v2115_v3, %v586_v35 }
 0x2dd   : > { %2563 = vrcp.f32 %v667_v36  ;;  %v689_v36 = vsub.f32 %v3114_v34, %v3114_v34 }
 0x2de   : > { %v628_v40 = vpop.xlane.xlu1 %627 }
 0x2df   : > { %v626_v39 = vpop.xlane.xlu0 %625  ;;  %v638_v54 = vadd.f32 %v628_v40, %v3169_v50  ;;  %v691_v40 = vsub.f32 %v3112_v32, %v3112_v32 }
 0x2e0   : > { %v637_v41 = vadd.f32 %v626_v39, %v3164_v37  ;;  %v2558_v42 = vpop.eup %2557 }
 0x2e1   : > { %v2560_v43 = vpop.eup %2559  ;;  %v668_v45 = vadd.f32 1.0, %v2558_v42  ;;  %v2122_v62 = vmul.f32 -1.442695, %v638_v54 }
 0x2e2   : > { %v665_v47 = vadd.f32 1.0, %v2560_v43  ;;  %v2121_v52 = vmul.f32 -1.442695, %v637_v41  ;;  %v632_v57 = vpop.xlane.xlu1 %631 }
 0x2e3   : > { %v630_v51 = vpop.xlane.xlu0 %629  ;;  %2565 = vrcp.f32 %v668_v45  ;;  %v640_v63 = vadd.f32 %v632_v57, %v3173_v60  ;;  %v690_v45 = vsub.f32 %v3123_v44, %v3123_v44 }
 0x2e4   : > { %v639_v53 = vadd.f32 %v630_v51, %v3167_v46  ;;  %2567 = vrcp.f32 %v665_v47 }
 0x2e5   : > { %2569 = vpow2.f32 %v2121_v52  ;;  %v2124_v4 = vmul.f32 -1.442695, %v640_v63 }
 0x2e6   : > { %v2123_v58 = vmul.f32 -1.442695, %v639_v53  ;;  %v2562_v59 = vpop.eup %2561 }
 0x2e7   : > { %v666_v61 = vadd.f32 1.0, %v2562_v59 }
 0x2e8   : > { %2571 = vpow2.f32 %v2123_v58 }
 0x2e9   : > { %2573 = vrcp.f32 %v666_v61 }
 0x2ea   : > { %v2564_v1 = vpop.eup %2563  ;;  %2575 = vpow2.f32 %v2122_v62 }
 0x2eb   : > { %709 = vperm.xlu1 %2514, %v2564_v1   ;;  %2577 = vpow2.f32 %v2124_v4 }
 0x2f0   : > { %v2566_v5 = vpop.eup %2565 }
 0x2f1   : > { %v2568_v3 = vpop.eup %2567  ;;  %714 = vperm.xlu1 %2514, %v2566_v5  }
 0x2f2   : > { %699 = vperm.xlu0 %2513, %v2568_v3   ;;  %v2570_v8 = vpop.eup %2569  ;;  %v695_v3 = vsub.f32 %v3129_v48, %v3129_v48 }
 0x2f3   : > { %v669_v17 = vadd.f32 1.0, %v2570_v8 }
 0x2f5   : > { %v2572_v9 = vpop.eup %2571 }
 0x2f6   : > { %v2574_v14 = vpop.eup %2573  ;;  %v671_v15 = vadd.f32 1.0, %v2572_v9 }
 0x2f7   : > { %704 = vperm.xlu1 %2514, %v2574_v14   ;;  %v2576_v18 = vpop.eup %2575 }
 0x2f8   : > { %2579 = vrcp.f32 %v671_v15  ;;  %v670_v19 = vadd.f32 1.0, %v2576_v18  ;;  %v2578_v20 = vpop.eup %2577 }
 0x2f9   : > { %2581 = vrcp.f32 %v669_v17  ;;  %v672_v21 = vadd.f32 1.0, %v2578_v20 }
 0x2fa   : > { %2583 = vrcp.f32 %v670_v19 }
 0x2fb   : > { %2585 = vrcp.f32 %v672_v21 }
 0x305   : > { %v2580_v23 = vpop.eup %2579 }
 0x306   : > { %729 = vperm.xlu1 %2514, %v2580_v23   ;;  %v2582_v24 = vpop.eup %2581 }
 0x307   : > { %v2584_v28 = vpop.eup %2583 }
 0x308   : > { %v2586_v29 = vpop.eup %2585 }
 0x30a   : > { %719 = vperm.xlu1 %2514, %v2582_v24  }
 0x30e   : > { %724 = vperm.xlu1 %2514, %v2584_v28  }
 0x312   : > { %734 = vperm.xlu1 %2514, %v2586_v29  }
 0x366   : > { %v710_v31 = vpop.permute.xlu1 %709 }
 0x367   : > { %v739_v43 = vmul.f32 %v710_v31, %v691_v40 }
 0x369   : > { %v747_v54 = vadd.f32 %v739_v43, %v3112_v32 }
 0x36b   : > { %v755_v62 = vmax.f32 %v747_v54, 0.0  ;;  %v2133_v54 = vld [vmem:[#allocation8 + $0x1] ss:$0 sm:$0xff] }
 0x36c   : > { %v715_v35 = vpop.permute.xlu1 %714 }
 0x36d   : > { %v700_v39 = vpop.permute.xlu0 %699  ;;  %v740_v41 = vmul.f32 %v715_v35, %v692_v33 }
 0x36e   : > { %v737_v42 = vmul.f32 %v700_v39, %v689_v36 }
 0x36f   : > { %v748_v47 = vadd.f32 %v740_v41, %v3119_v38 }
 0x370   : > { %v745_v52 = vadd.f32 %v737_v42, %v3114_v34 }
 0x371   : > { %v756_v58 = vmax.f32 %v748_v47, 0.0 }
 0x372   : > { %v705_v51 = vpop.permute.xlu1 %704  ;;  %v753_v59 = vmax.f32 %v745_v52, 0.0 }
 0x373   : > { %v738_v53 = vmul.f32 %v705_v51, %v690_v45  ;;  %v762_v0 = vpack.c.bf16 %v756_v58, %v755_v62 }
 0x375   : > { %v746_v57 = vadd.f32 %v738_v53, %v3123_v44 }
 0x377   : > { %v754_v61 = vmax.f32 %v746_v57, 0.0 }
 0x379   : > { %v761_v63 = vpack.c.bf16 %v754_v61, %v753_v59 }
 0x37b   : > { %2330 = vmatprep.mubr.bf16.mxu1 %v761_v63 }
 0x37c   : > { %2331 = vmatmul.mubr.bf16.vlgmr.msra.gmra.mxu1 %v762_v0 }
 0x381   : > { %v730_v1 = vpop.permute.xlu1 %729 }
 0x382   : > { %v743_v9 = vmul.f32 %v730_v1, %v695_v3 }
 0x384   : > { %v751_v18 = vadd.f32 %v743_v9, %v3129_v48 }
 0x385   : > { %v720_v4 = vpop.permute.xlu1 %719 }
 0x386   : > { %v741_v5 = vmul.f32 %v720_v4, %v693_v2  ;;  %v759_v28 = vmax.f32 %v751_v18, 0.0 }
 0x388   : > { %v749_v10 = vadd.f32 %v741_v5, %v3138_v55 }
 0x389   : > { %v725_v8 = vpop.permute.xlu1 %724 }
 0x38a   : > { %v742_v14 = vmul.f32 %v725_v8, %v694_v7  ;;  %v757_v19 = vmax.f32 %v749_v10, 0.0 }
 0x38c   : > { %v750_v15 = vadd.f32 %v742_v14, %v3140_v56 }
 0x38d   : > { %v735_v17 = vpop.permute.xlu1 %734 }
 0x38e   : > { %v758_v20 = vmax.f32 %v750_v15, 0.0  ;;  %v744_v21 = vmul.f32 %v735_v17, %v696_v16 }
 0x390   : > { %v752_v23 = vadd.f32 %v744_v21, %v3131_v49  ;;  %v763_v24 = vpack.c.bf16 %v758_v20, %v757_v19 }
 0x392   : > { %v760_v29 = vmax.f32 %v752_v23, 0.0  ;;  %2334 = vmatprep.mubr.bf16.mxu1 %v763_v24 }
 0x394   : > { %v764_v31 = vpack.c.bf16 %v760_v29, %v759_v28 }
 0x396   : > { %2335 = vmatmul.mubr.bf16.gmra.mxu1 %v764_v31 }
 0x397   : > { %2386 = vmatprep.mubr.msk.bf16.mxu1 %vm484_vm0, %v3089_v12 }
 0x43c   : > { %v2332_v33 = vpop.f32.mrf.mxu1 }
 0x43e   : > { %v864_v35 = vpop.f32.mrf.mxu1 }
 0x440   : > { %v2333_v36 = vpop.f32.mrf.mxu1 }
 0x441   : > { %v896_v51 = vpack.c.bf16 %v2333_v36, %v2332_v33 }
 0x442   : > { %v867_v39 = vpop.f32.mrf.mxu1 }
 0x443   : > { %v895_v52 = vpack.c.bf16 %v867_v39, %v864_v35 }
 0x456   : > { %v2336_v40 = vpop.f32.mrf.mxu1 }
 0x458   : > { %v880_v41 = vpop.f32.mrf.mxu1 }
 0x45a   : > { %v2337_v42 = vpop.f32.mrf.mxu1 }
 0x45b   : > { %v898_v43 = vpack.c.bf16 %v2337_v42, %v2336_v40 }
 0x45c   : > { %v883_v45 = vpop.f32.mrf.mxu1 }
 0x45d   : > { %v897_v47 = vpack.c.bf16 %v883_v45, %v880_v41  ;;  %2338 = vmatprep.subr.bf16.mxu0 %v898_v43 }
 0x45e   : > { %2339 = vmatpush3.bf16.msra.mxu0 %v898_v43 }
 0x45f   : > { %2340 = vmatprep.subr.bf16.mxu0 %v897_v47 }
 0x462   : > { %2341 = vmatpush3.bf16.msra.mxu0 %v897_v47 }
 0x463   : > { %2342 = vmatprep.subr.bf16.mxu0 %v896_v51 }
 0x466   : > { %2343 = vmatpush3.bf16.msra.mxu0 %v896_v51 }
 0x467   : > { %2344 = vmatprep.subr.bf16.mxu0 %v895_v52 }
 0x46a   : > { %2345 = vmatpush3.bf16.msra.mxu0 %v895_v52 }
 0x46d   : > { %2347 = vmatmul.mubr.msk.bf16.vlgmr.msra.gmra.mxu0 %vm484_vm0, %v3096_v25 }
 0x46e   : > { %2350 = vmatprep.mubr.msk.bf16.mxu0 %vm484_vm0, %v3099_v26 }
 0x475   : > { %2351 = vmatmul.mubr.msk.bf16.gmra.mxu0 %vm484_vm0, %v3106_v27 }
 0x52d   : > { %v2348_v12 = vpop.f32.mrf.mxu0 }
 0x52e   : > { %v3210_v61 = vadd.f32 %v2348_v12, %v2133_v54 }
 0x52f   : > { %v938_v53 = vpop.f32.mrf.mxu0 }
 0x530   : > { %v3208_v58 = vadd.f32 %v2133_v54, %v938_v53  ;;  %v986_v27 = vmul.f32 %v3210_v61, %v3210_v61 }
 0x531   : > { %v2349_v57 = vpop.f32.mrf.mxu0 }
 0x532   : > { %v984_v25 = vmul.f32 %v3208_v58, %v3208_v58  ;;  %v950_v0 = vadd.f32 %v2349_v57, %v2133_v54 }
 0x533   : > { %v941_v59 = vpop.f32.mrf.mxu0 }
 0x534   : > { %v942_v62 = vadd.f32 %v2133_v54, %v941_v59  ;;  %v987_v8 = vmul.f32 %v950_v0, %v950_v0 }
 0x535   : > { %v2352_v63 = vpop.f32.mrf.mxu0 }
 0x536   : > { %v969_v26 = vadd.f32 %v942_v62, %v3208_v58  ;;  %v985_v1 = vmul.f32 %v942_v62, %v942_v62  ;;  %v963_v14 = vadd.f32 %v2352_v63, %v2133_v54 }
 0x537   : > { %v954_v2 = vpop.f32.mrf.mxu0 }
 0x538   : > { %v970_v4 = vadd.f32 %v969_v26, %v3210_v61  ;;  %v992_v5 = vadd.f32 %v985_v1, %v984_v25  ;;  %v955_v3 = vadd.f32 %v2133_v54, %v954_v2  ;;  %v990_v28 = vmul.f32 %v963_v14, %v963_v14 }
 0x539   : > { %v2353_v7 = vpop.f32.mrf.mxu0 }
 0x53a   : > { %v993_v9 = vadd.f32 %v992_v5, %v986_v27  ;;  %v971_v10 = vadd.f32 %v970_v4, %v950_v0  ;;  %v988_v17 = vmul.f32 %v955_v3, %v955_v3  ;;  %v966_v21 = vadd.f32 %v2353_v7, %v2133_v54 }
 0x53b   : > { %v957_v15 = vpop.f32.mrf.mxu0 }
 0x53c   : > { %v972_v16 = vadd.f32 %v971_v10, %v955_v3  ;;  %v994_v18 = vadd.f32 %v993_v9, %v987_v8  ;;  %v958_v19 = vadd.f32 %v2133_v54, %v957_v15  ;;  %v991_v33 = vmul.f32 %v966_v21, %v966_v21  ;;  %v2138_v9 = vld [vmem:[#allocation8 + $0x4] ss:$0 sm:$0xff] }
 0x53e   : > { %v995_v20 = vadd.f32 %v994_v18, %v988_v17  ;;  %v973_v23 = vadd.f32 %v972_v16, %v958_v19  ;;  %v989_v24 = vmul.f32 %v958_v19, %v958_v19 }
 0x540   : > { %v974_v29 = vadd.f32 %v973_v23, %v963_v14  ;;  %v996_v31 = vadd.f32 %v995_v20, %v989_v24  ;;  %v2139_v23 = vld [vmem:[#allocation8 + $0x7] ss:$0 sm:$0xff] }
 0x542   : > { %v975_v35 = vadd.f32 %v974_v29, %v966_v21  ;;  %v997_v36 = vadd.f32 %v996_v31, %v990_v28 }
 0x544   : > { %v976_v39 = vrot.slane %v975_v35, 4  ;;  %v998_v40 = vadd.f32 %v997_v36, %v991_v33 }
 0x546   : > { %v977_v41 = vadd.f32 %v976_v39, %v975_v35  ;;  %v999_v42 = vrot.slane %v998_v40, 4 }
 0x548   : > { %v978_v43 = vrot.slane %v977_v41, 2  ;;  %v1000_v45 = vadd.f32 %v999_v42, %v998_v40 }
 0x54a   : > { %v979_v47 = vadd.f32 %v978_v43, %v977_v41  ;;  %v1001_v51 = vrot.slane %v1000_v45, 2 }
 0x54c   : > { %v980_v52 = vrot.slane %v979_v47, 1  ;;  %v1002_v12 = vadd.f32 %v1001_v51, %v1000_v45 }
 0x54e   : > { %v981_v53 = vadd.f32 %v980_v52, %v979_v47  ;;  %v1003_v54 = vrot.slane %v1002_v12, 1 }
 0x550   : > { %v983_v57 = vmul.f32 0.015625, %v981_v53  ;;  %v1004_v59 = vadd.f32 %v1003_v54, %v1002_v12 }
 0x552   : > { %v1005_v63 = vmul.f32 0.015625, %v1004_v59  ;;  %v1006_v25 = vmul.f32 %v983_v57, %v983_v57  ;;  %v1010_v27 = vsub.f32 %v942_v62, %v983_v57  ;;  %v1009_v4 = vsub.f32 %v3208_v58, %v983_v57 }
 0x553   : > { %v1011_v5 = vsub.f32 %v3210_v61, %v983_v57  ;;  %v1014_v8 = vsub.f32 %v958_v19, %v983_v57  ;;  %v1012_v10 = vsub.f32 %v950_v0, %v983_v57  ;;  %v1013_v15 = vsub.f32 %v955_v3, %v983_v57 }
 0x554   : > { %v1007_v26 = vsub.f32 %v1005_v63, %v1006_v25  ;;  %v1015_v35 = vsub.f32 %v963_v14, %v983_v57  ;;  %v1016_v58 = vsub.f32 %v966_v21, %v983_v57  ;;  %v2539_v25 = vld [vmem:[#allocation7 + $0xb8] sm:$0xff]  }
 0x555   : > { %2354 = vmatprep.subr.bf16.mxu0 %v2539_v25 }
 0x556   : > { %v1008_v1 = vmax.f32 %v1007_v26, 0.0  ;;  %v2540_v26 = vld [vmem:[#allocation7 + $0xb0] sm:$0xff]   ;;  %2355 = vmatpush3.bf16.msra.mxu0 %v2539_v25 }
 0x557   : > { %2356 = vmatprep.subr.bf16.mxu0 %v2540_v26 }
 0x558   : > { %v1017_v2 = vadd.f32 1e-05, %v1008_v1  ;;  %v2541_v1 = vld [vmem:[#allocation7 + $0xa8] sm:$0xff]  }
 0x55a   : > { %2587 = vrsqrt.f32 %v1017_v2  ;;  %2357 = vmatpush3.bf16.msra.mxu0 %v2540_v26  ;;  %v2542_v2 = vld [vmem:[#allocation7 + $0xa0] sm:$0xff]  }
 0x55b   : > { %2358 = vmatprep.subr.bf16.mxu0 %v2541_v1 }
 0x55e   : > { %2359 = vmatpush3.bf16.msra.mxu0 %v2541_v1 }
 0x55f   : > { %2360 = vmatprep.subr.bf16.mxu0 %v2542_v2 }
 0x562   : > { %2361 = vmatpush3.bf16.msra.mxu0 %v2542_v2 }
 0x567   : > { %v2588_v7 = vpop.eup %2587 }
 0x568   : > { %v1020_v16 = vmul.f32 %v2588_v7, %v1010_v27  ;;  %v1019_v17 = vmul.f32 %v2588_v7, %v1009_v4  ;;  %v1021_v18 = vmul.f32 %v2588_v7, %v1011_v5  ;;  %v1024_v20 = vmul.f32 %v2588_v7, %v1014_v8  ;;  %v2543_v27 = vld [vmem:[#allocation7 + $0x98] sm:$0xff]  }
 0x569   : > { %v1022_v24 = vmul.f32 %v2588_v7, %v1012_v10  ;;  %v1023_v28 = vmul.f32 %v2588_v7, %v1013_v15  ;;  %v1025_v3 = vmul.f32 %v2588_v7, %v1015_v35  ;;  %v1026_v39 = vmul.f32 %v2588_v7, %v1016_v58  ;;  %2362 = vmatprep.subr.bf16.mxu0 %v2543_v27 }
 0x56a   : > { %v1033_v29 = vmul.f32 %v2138_v9, %v1020_v16  ;;  %v1032_v31 = vmul.f32 %v2138_v9, %v1019_v17  ;;  %v1034_v33 = vmul.f32 %v2138_v9, %v1021_v18  ;;  %v1037_v0 = vmul.f32 %v2138_v9, %v1024_v20  ;;  %2363 = vmatpush3.bf16.msra.mxu0 %v2543_v27  ;;  %v2544_v27 = vld [vmem:[#allocation7 + $0x90] sm:$0xff]  }
 0x56b   : > { %v1035_v62 = vmul.f32 %v2138_v9, %v1022_v24  ;;  %v1036_v19 = vmul.f32 %v2138_v9, %v1023_v28  ;;  %v1038_v14 = vmul.f32 %v2138_v9, %v1025_v3  ;;  %v1039_v21 = vmul.f32 %v2138_v9, %v1026_v39  ;;  %2364 = vmatprep.subr.bf16.mxu0 %v2544_v27 }
 0x56c   : > { %v3220_v36 = vadd.f32 %v2139_v23, %v1033_v29  ;;  %v3222_v61 = vadd.f32 %v2139_v23, %v1032_v31  ;;  %v3228_v42 = vadd.f32 %v2139_v23, %v1034_v33  ;;  %v3238_v52 = vadd.f32 %v2139_v23, %v1037_v0 }
 0x56d   : > { %v3230_v43 = vadd.f32 %v2139_v23, %v1035_v62  ;;  %v3236_v51 = vadd.f32 %v2139_v23, %v1036_v19  ;;  %v3244_v54 = vadd.f32 %v2139_v23, %v1038_v14  ;;  %v3246_v57 = vadd.f32 %v2139_v23, %v1039_v21 }
 0x56e   : > { %v1054_v40 = vmul.f32 %v3110_v30, %v3220_v36  ;;  %v1053_v41 = vmul.f32 %v3110_v30, %v3222_v61  ;;  %v1055_v45 = vmul.f32 %v3110_v30, %v3228_v42  ;;  %v1058_v53 = vmul.f32 %v3110_v30, %v3238_v52  ;;  %2365 = vmatpush3.bf16.msra.mxu0 %v2544_v27 }
 0x56f   : > { %v1056_v47 = vmul.f32 %v3110_v30, %v3230_v43  ;;  %v1057_v12 = vmul.f32 %v3110_v30, %v3236_v51  ;;  %v1059_v59 = vmul.f32 %v3110_v30, %v3244_v54  ;;  %v1060_v63 = vmul.f32 %v3110_v30, %v3246_v57 }
 0x570   : > { %1063 = vadd.xlane.f32.xlu0 %v1054_v40  ;;  %1061 = vadd.xlane.f32.xlu1 %v1053_v41 }
 0x574   : > { %1065 = vadd.xlane.f32.xlu0 %v1055_v45  ;;  %1067 = vadd.xlane.f32.xlu1 %v1056_v47 }
 0x578   : > { %1069 = vadd.xlane.f32.xlu0 %v1057_v12  ;;  %1071 = vadd.xlane.f32.xlu1 %v1058_v53 }
 0x57c   : > { %1073 = vadd.xlane.f32.xlu0 %v1059_v59  ;;  %1075 = vadd.xlane.f32.xlu1 %v1060_v63 }
 0x5f9   : > { %v1064_v4 = vpop.xlane.xlu0 %1063  ;;  %v1062_v5 = vpop.xlane.xlu1 %1061 }
 0x5fa   : > { %v1078_v30 = vadd.f32 %v1064_v4, %v3161_v22  ;;  %v1077_v7 = vadd.f32 %v1062_v5, %v3157_v13 }
 0x5fc   : > { %v2141_v8 = vmul.f32 -1.442695, %v1078_v30  ;;  %v2140_v9 = vmul.f32 -1.442695, %v1077_v7  ;;  %v2545_v7 = vld [vmem:[#allocation7 + $0x88] sm:$0xff]  }
 0x5fd   : > { %v1066_v10 = vpop.xlane.xlu0 %1065  ;;  %v1068_v15 = vpop.xlane.xlu1 %1067  ;;  %2366 = vmatprep.subr.bf16.mxu0 %v2545_v7 }
 0x5fe   : > { %2589 = vpow2.f32 %v2141_v8  ;;  %v1079_v16 = vadd.f32 %v1066_v10, %v3152_v6  ;;  %v1080_v17 = vadd.f32 %v1068_v15, %v3155_v11  ;;  %2367 = vmatpush3.bf16.msra.mxu0 %v2545_v7  ;;  %v2546_v10 = vld [vmem:[#allocation7 + $0x80] sm:$0xff]  }
 0x5ff   : > { %2591 = vpow2.f32 %v2140_v9  ;;  %2368 = vmatprep.subr.bf16.mxu0 %v2546_v10 }
 0x600   : > { %v2142_v18 = vmul.f32 -1.442695, %v1079_v16  ;;  %v2143_v20 = vmul.f32 -1.442695, %v1080_v17 }
 0x601   : > { %v1070_v23 = vpop.xlane.xlu0 %1069  ;;  %v1072_v24 = vpop.xlane.xlu1 %1071 }
 0x602   : > { %2593 = vpow2.f32 %v2142_v18  ;;  %v1081_v28 = vadd.f32 %v1070_v23, %v3164_v37  ;;  %v1082_v29 = vadd.f32 %v1072_v24, %v3169_v50  ;;  %2369 = vmatpush3.bf16.msra.mxu0 %v2546_v10  ;;  %v1133_v23 = vsub.f32 %v3114_v34, %v3222_v61 }
 0x603   : > { %2595 = vpow2.f32 %v2143_v20  ;;  %v1134_v20 = vsub.f32 %v3123_v44, %v3220_v36 }
 0x604   : > { %v2144_v31 = vmul.f32 -1.442695, %v1081_v28  ;;  %v2145_v33 = vmul.f32 -1.442695, %v1082_v29 }
 0x605   : > { %v1074_v62 = vpop.xlane.xlu0 %1073  ;;  %v1076_v35 = vpop.xlane.xlu1 %1075 }
 0x606   : > { %2597 = vpow2.f32 %v2144_v31  ;;  %v1083_v58 = vadd.f32 %v1074_v62, %v3167_v46  ;;  %v1084_v19 = vadd.f32 %v1076_v35, %v3173_v60  ;;  %v1135_v62 = vsub.f32 %v3112_v32, %v3228_v42 }
 0x607   : > { %2599 = vpow2.f32 %v2145_v33 }
 0x608   : > { %v2146_v0 = vmul.f32 -1.442695, %v1083_v58  ;;  %v2147_v3 = vmul.f32 -1.442695, %v1084_v19  ;;  %v1136_v58 = vsub.f32 %v3119_v38, %v3230_v43 }
 0x60a   : > { %2601 = vpow2.f32 %v2146_v0 }
 0x60b   : > { %v2590_v39 = vpop.eup %2589  ;;  %2603 = vpow2.f32 %v2147_v3 }
 0x60c   : > { %v2592_v40 = vpop.eup %2591  ;;  %v1110_v41 = vadd.f32 1.0, %v2590_v39 }
 0x60d   : > { %v1109_v14 = vadd.f32 1.0, %v2592_v40 }
 0x60e   : > { %2605 = vrcp.f32 %v1110_v41 }
 0x60f   : > { %v2594_v21 = vpop.eup %2593  ;;  %2607 = vrcp.f32 %v1109_v14 }
 0x610   : > { %v2596_v45 = vpop.eup %2595  ;;  %v1111_v47 = vadd.f32 1.0, %v2594_v21  ;;  %v1137_v21 = vsub.f32 %v3138_v55, %v3236_v51 }
 0x611   : > { %v1112_v12 = vadd.f32 1.0, %v2596_v45  ;;  %v1138_v45 = vsub.f32 %v3140_v56, %v3238_v52 }
 0x612   : > { %2609 = vrcp.f32 %v1111_v47 }
 0x613   : > { %v2598_v53 = vpop.eup %2597  ;;  %2611 = vrcp.f32 %v1112_v12 }
 0x614   : > { %v2600_v59 = vpop.eup %2599  ;;  %v1113_v63 = vadd.f32 1.0, %v2598_v53 }
 0x615   : > { %v1114_v25 = vadd.f32 1.0, %v2600_v59 }
 0x616   : > { %2613 = vrcp.f32 %v1113_v63 }
 0x617   : > { %v2602_v26 = vpop.eup %2601  ;;  %2615 = vrcp.f32 %v1114_v25 }
 0x618   : > { %v2604_v1 = vpop.eup %2603  ;;  %v1115_v2 = vadd.f32 1.0, %v2602_v26 }
 0x619   : > { %v1116_v4 = vadd.f32 1.0, %v2604_v1 }
 0x61a   : > { %2617 = vrcp.f32 %v1115_v2 }
 0x61b   : > { %v2606_v5 = vpop.eup %2605  ;;  %2619 = vrcp.f32 %v1116_v4 }
 0x61c   : > { %v2608_v30 = vpop.eup %2607  ;;  %1148 = vperm.xlu1 %2514, %v2606_v5  }
 0x61d   : > { %1143 = vperm.xlu0 %2513, %v2608_v30  }
 0x61f   : > { %v2610_v8 = vpop.eup %2609 }
 0x620   : > { %v2612_v9 = vpop.eup %2611  ;;  %1153 = vperm.xlu1 %2514, %v2610_v8  }
 0x621   : > { %1158 = vperm.xlu0 %2513, %v2612_v9  }
 0x623   : > { %v2614_v15 = vpop.eup %2613 }
 0x624   : > { %v2616_v16 = vpop.eup %2615  ;;  %1163 = vperm.xlu1 %2514, %v2614_v15  }
 0x625   : > { %1168 = vperm.xlu0 %2513, %v2616_v16  }
 0x627   : > { %v2618_v17 = vpop.eup %2617 }
 0x628   : > { %v2620_v18 = vpop.eup %2619  ;;  %1173 = vperm.xlu1 %2514, %v2618_v17   ;;  %v2657_v17 = vld [vmem:[%s3070_s14] sm:$0xff]  }
 0x629   : > { %1178 = vperm.xlu0 %2513, %v2620_v18  }
 0x697   : > { %v1149_v24 = vpop.permute.xlu1 %1148 }
 0x698   : > { %v1144_v28 = vpop.permute.xlu0 %1143  ;;  %v1182_v29 = vmul.f32 %v1149_v24, %v1134_v20 }
 0x699   : > { %v1181_v31 = vmul.f32 %v1144_v28, %v1133_v23 }
 0x69a   : > { %v1190_v33 = vadd.f32 %v1182_v29, %v3220_v36 }
 0x69b   : > { %v1189_v35 = vadd.f32 %v1181_v31, %v3222_v61  ;;  %v1154_v19 = vpop.permute.xlu1 %1153 }
 0x69c   : > { %v1198_v0 = vmax.f32 %v1190_v33, 0.0  ;;  %v1159_v3 = vpop.permute.xlu0 %1158  ;;  %v1183_v39 = vmul.f32 %v1154_v19, %v1135_v62  ;;  %v3292_v19 = vld [vmem:[%s3070_s14 + $0x10] sm:$0xff]  }
 0x69d   : > { %v1197_v40 = vmax.f32 %v1189_v35, 0.0  ;;  %v1184_v41 = vmul.f32 %v1159_v3, %v1136_v58  ;;  %v3287_v58 = vld [vmem:[%s3070_s14 + $0x8] sm:$0xff]  }
 0x69e   : > { %v1191_v14 = vadd.f32 %v1183_v39, %v3228_v42  ;;  %v1139_v42 = vsub.f32 %v3129_v48, %v3244_v54 }
 0x69f   : > { %v1192_v36 = vadd.f32 %v1184_v41, %v3230_v43  ;;  %v1164_v61 = vpop.permute.xlu1 %1163  ;;  %v1205_v47 = vpack.c.bf16 %v1198_v0, %v1197_v40  ;;  %v1140_v43 = vsub.f32 %v3131_v49, %v3246_v57  ;;  %v3297_v0 = vld [vmem:[%s3070_s14 + $0x18] sm:$0xff]   ;;  %v2156_v40 = vld [vmem:[#allocation8 + $0x2] ss:$0 sm:$0xff] }
 0x6a0   : > { %v1199_v12 = vmax.f32 %v1191_v14, 0.0  ;;  %v1169_v53 = vpop.permute.xlu0 %1168  ;;  %v1185_v59 = vmul.f32 %v1164_v61, %v1137_v21 }
 0x6a1   : > { %v1200_v63 = vmax.f32 %v1192_v36, 0.0  ;;  %v1186_v25 = vmul.f32 %v1169_v53, %v1138_v45  ;;  %2370 = vmatprep.mubr.bf16.mxu0 %v1205_v47 }
 0x6a2   : > { %v1193_v26 = vadd.f32 %v1185_v59, %v3236_v51 }
 0x6a3   : > { %v1206_v1 = vpack.c.bf16 %v1200_v63, %v1199_v12  ;;  %v1194_v2 = vadd.f32 %v1186_v25, %v3238_v52  ;;  %v1174_v27 = vpop.permute.xlu1 %1173 }
 0x6a4   : > { %v1201_v4 = vmax.f32 %v1193_v26, 0.0  ;;  %v1179_v5 = vpop.permute.xlu0 %1178  ;;  %v1187_v30 = vmul.f32 %v1174_v27, %v1139_v42 }
 0x6a5   : > { %v1202_v7 = vmax.f32 %v1194_v2, 0.0  ;;  %v1188_v8 = vmul.f32 %v1179_v5, %v1140_v43  ;;  %2371 = vmatmul.mubr.bf16.vlgmr.msra.gmra.mxu0 %v1206_v1 }
 0x6a6   : > { %v1195_v9 = vadd.f32 %v1187_v30, %v3244_v54 }
 0x6a7   : > { %v1196_v51 = vadd.f32 %v1188_v8, %v3246_v57  ;;  %v1207_v10 = vpack.c.bf16 %v1202_v7, %v1201_v4 }
 0x6a8   : > { %v1203_v15 = vmax.f32 %v1195_v9, 0.0 }
 0x6a9   : > { %v1204_v16 = vmax.f32 %v1196_v51, 0.0  ;;  %2374 = vmatprep.mubr.bf16.mxu0 %v1207_v10 }
 0x6ab   : > { %v1208_v52 = vpack.c.bf16 %v1204_v16, %v1203_v15 }
 0x6ad   : > { %2375 = vmatmul.mubr.bf16.gmra.mxu0 %v1208_v52 }
 0x6ae   : > { %2426 = vmatprep.mubr.msk.bf16.mxu0 %vm484_vm0, %v2657_v17 }
 0x765   : > { %v2372_v18 = vpop.f32.mrf.mxu0 }
 0x767   : > { %v1308_v20 = vpop.f32.mrf.mxu0 }
 0x769   : > { %v2373_v23 = vpop.f32.mrf.mxu0 }
 0x76a   : > { %v1340_v62 = vpack.c.bf16 %v2373_v23, %v2372_v18 }
 0x76b   : > { %v1311_v24 = vpop.f32.mrf.mxu0 }
 0x76c   : > { %v1339_v35 = vpack.c.bf16 %v1311_v24, %v1308_v20 }
 0x76d   : > { %v2376_v28 = vpop.f32.mrf.mxu0 }
 0x76f   : > { %v1324_v29 = vpop.f32.mrf.mxu0 }
 0x771   : > { %v2377_v31 = vpop.f32.mrf.mxu0 }
 0x772   : > { %v1342_v54 = vpack.c.bf16 %v2377_v31, %v2376_v28 }
 0x773   : > { %v1327_v57 = vpop.f32.mrf.mxu0 }
 0x774   : > { %v1341_v33 = vpack.c.bf16 %v1327_v57, %v1324_v29  ;;  %2378 = vmatprep.subr.bf16.mxu1 %v1342_v54 }
 0x775   : > { %2379 = vmatpush3.bf16.msra.mxu1 %v1342_v54 }
 0x776   : > { %2380 = vmatprep.subr.bf16.mxu1 %v1341_v33 }
 0x779   : > { %2381 = vmatpush3.bf16.msra.mxu1 %v1341_v33 }
 0x77a   : > { %2382 = vmatprep.subr.bf16.mxu1 %v1340_v62 }
 0x77d   : > { %2383 = vmatpush3.bf16.msra.mxu1 %v1340_v62 }
 0x77e   : > { %2384 = vmatprep.subr.bf16.mxu1 %v1339_v35 }
 0x781   : > { %2385 = vmatpush3.bf16.msra.mxu1 %v1339_v35 }
 0x784   : > { %2387 = vmatmul.mubr.msk.bf16.vlgmr.msra.gmra.mxu1 %vm484_vm0, %v3287_v58 }
 0x785   : > { %2390 = vmatprep.mubr.msk.bf16.mxu1 %vm484_vm0, %v3292_v19 }
 0x78c   : > { %2391 = vmatmul.mubr.msk.bf16.gmra.mxu1 %vm484_vm0, %v3297_v0 }
 0x844   : > { %v2388_v3 = vpop.f32.mrf.mxu1 }
 0x845   : > { %v3303_v36 = vadd.f32 %v2388_v3, %v2156_v40 }
 0x846   : > { %v1382_v39 = vpop.f32.mrf.mxu1 }
 0x847   : > { %v3301_v14 = vadd.f32 %v2156_v40, %v1382_v39  ;;  %v1429_v25 = vmul.f32 %v3303_v36, %v3303_v36 }
 0x848   : > { %v2389_v41 = vpop.f32.mrf.mxu1 }
 0x849   : > { %v1427_v47 = vmul.f32 %v3301_v14, %v3301_v14  ;;  %v1394_v12 = vadd.f32 %v2389_v41, %v2156_v40 }
 0x84a   : > { %v1385_v21 = vpop.f32.mrf.mxu1 }
 0x84b   : > { %v1386_v45 = vadd.f32 %v2156_v40, %v1385_v21  ;;  %v1430_v43 = vmul.f32 %v1394_v12, %v1394_v12 }
 0x84c   : > { %v2392_v61 = vpop.f32.mrf.mxu1 }
 0x84d   : > { %v1413_v53 = vadd.f32 %v1386_v45, %v3301_v14  ;;  %v1428_v59 = vmul.f32 %v1386_v45, %v1386_v45  ;;  %v1407_v5 = vadd.f32 %v2392_v61, %v2156_v40 }
 0x84e   : > { %v1398_v63 = vpop.f32.mrf.mxu1 }
 0x84f   : > { %v1414_v26 = vadd.f32 %v1413_v53, %v3303_v36  ;;  %v1435_v42 = vadd.f32 %v1428_v59, %v1427_v47  ;;  %v1399_v1 = vadd.f32 %v2156_v40, %v1398_v63  ;;  %v1433_v17 = vmul.f32 %v1407_v5, %v1407_v5 }
 0x850   : > { %v2393_v2 = vpop.f32.mrf.mxu1 }
 0x851   : > { %v1436_v27 = vadd.f32 %v1435_v42, %v1429_v25  ;;  %v1415_v4 = vadd.f32 %v1414_v26, %v1394_v12  ;;  %v1431_v8 = vmul.f32 %v1399_v1, %v1399_v1  ;;  %v1410_v15 = vadd.f32 %v2393_v2, %v2156_v40 }
 0x852   : > { %v1401_v30 = vpop.f32.mrf.mxu1 }
 0x853   : > { %v1416_v7 = vadd.f32 %v1415_v4, %v1399_v1  ;;  %v1437_v9 = vadd.f32 %v1436_v27, %v1430_v43  ;;  %v1402_v51 = vadd.f32 %v2156_v40, %v1401_v30  ;;  %v1434_v23 = vmul.f32 %v1410_v15, %v1410_v15  ;;  %v2161_v30 = vld [vmem:[#allocation8 + $0x5] ss:$0 sm:$0xff] }
 0x855   : > { %v1438_v10 = vadd.f32 %v1437_v9, %v1431_v8  ;;  %v1417_v16 = vadd.f32 %v1416_v7, %v1402_v51  ;;  %v1432_v52 = vmul.f32 %v1402_v51, %v1402_v51 }
 0x857   : > { %v1418_v18 = vadd.f32 %v1417_v16, %v1407_v5  ;;  %v1439_v20 = vadd.f32 %v1438_v10, %v1432_v52 }
 0x859   : > { %v1419_v24 = vadd.f32 %v1418_v18, %v1410_v15  ;;  %v1440_v28 = vadd.f32 %v1439_v20, %v1433_v17  ;;  %v2162_v17 = vld [vmem:[#allocation8 + $0x8] ss:$0 sm:$0xff] }
 0x85b   : > { %v1420_v29 = vrot.slane %v1419_v24, 4  ;;  %v1441_v31 = vadd.f32 %v1440_v28, %v1434_v23 }
 0x85d   : > { %v1421_v54 = vadd.f32 %v1420_v29, %v1419_v24  ;;  %v1442_v57 = vrot.slane %v1441_v31, 4 }
 0x85f   : > { %v1422_v33 = vrot.slane %v1421_v54, 2  ;;  %v1443_v62 = vadd.f32 %v1442_v57, %v1441_v31  ;;  %v2661_v57 = vld [vmem:[#allocation8 + $0xa] ss:$0 sm:$0xff] }
 0x861   : > { %v1423_v35 = vadd.f32 %v1422_v33, %v1421_v54  ;;  %v1444_v3 = vrot.slane %v1443_v62, 2 }
 0x863   : > { %v1424_v39 = vrot.slane %v1423_v35, 1  ;;  %v1445_v41 = vadd.f32 %v1444_v3, %v1443_v62 }
 0x865   : > { %v1425_v21 = vadd.f32 %v1424_v39, %v1423_v35  ;;  %v1446_v40 = vrot.slane %v1445_v41, 1 }
 0x867   : > { %v1426_v61 = vmul.f32 0.015625, %v1425_v21  ;;  %v1447_v47 = vadd.f32 %v1446_v40, %v1445_v41 }
 0x869   : > { %v1448_v53 = vmul.f32 0.015625, %v1447_v47  ;;  %v1449_v59 = vmul.f32 %v1426_v61, %v1426_v61  ;;  %v1453_v42 = vsub.f32 %v1386_v45, %v1426_v61  ;;  %v1452_v2 = vsub.f32 %v3301_v14, %v1426_v61 }
 0x86a   : > { %v1454_v43 = vsub.f32 %v3303_v36, %v1426_v61  ;;  %v1457_v4 = vsub.f32 %v1402_v51, %v1426_v61  ;;  %v1455_v7 = vsub.f32 %v1394_v12, %v1426_v61  ;;  %v1456_v8 = vsub.f32 %v1399_v1, %v1426_v61 }
 0x86b   : > { %v1450_v63 = vsub.f32 %v1448_v53, %v1449_v59  ;;  %v1458_v29 = vsub.f32 %v1407_v5, %v1426_v61  ;;  %v1459_v14 = vsub.f32 %v1410_v15, %v1426_v61 }
 0x86d   : > { %v1451_v25 = vmax.f32 %v1450_v63, 0.0 }
 0x86f   : > { %v1460_v26 = vadd.f32 1e-05, %v1451_v25 }
 0x871   : > { %2621 = vrsqrt.f32 %v1460_v26  ;;  %v2547_v26 = vld [vmem:[#allocation7 + $0xf8] sm:$0xff]  }
 0x872   : > { %2394 = vmatprep.subr.bf16.mxu1 %v2547_v26 }
 0x873   : > { %2395 = vmatpush3.bf16.msra.mxu1 %v2547_v26  ;;  %v2552_v26 = vld [vmem:[#allocation7 + $0xd0] sm:$0xff]  }
 0x87e   : > { %v2622_v27 = vpop.eup %2621 }
 0x87f   : > { %v1463_v9 = vmul.f32 %v2622_v27, %v1453_v42  ;;  %v1462_v10 = vmul.f32 %v2622_v27, %v1452_v2  ;;  %v1464_v16 = vmul.f32 %v2622_v27, %v1454_v43  ;;  %v1467_v52 = vmul.f32 %v2622_v27, %v1457_v4  ;;  %v2548_v42 = vld [vmem:[#allocation7 + $0xf0] sm:$0xff]   ;;  %v2549_v2 = vld [vmem:[#allocation7 + $0xe8] sm:$0xff]   ;;  %v2550_v43 = vld [vmem:[#allocation7 + $0xe0] sm:$0xff]  }
 0x880   : > { %v1465_v18 = vmul.f32 %v2622_v27, %v1455_v7  ;;  %v1466_v20 = vmul.f32 %v2622_v27, %v1456_v8  ;;  %v1468_v1 = vmul.f32 %v2622_v27, %v1458_v29  ;;  %v1469_v54 = vmul.f32 %v2622_v27, %v1459_v14  ;;  %2396 = vmatprep.subr.bf16.mxu1 %v2548_v42  ;;  %v2551_v27 = vld [vmem:[#allocation7 + $0xd8] sm:$0xff]  }
 0x881   : > { %v1476_v23 = vmul.f32 %v2161_v30, %v1463_v9  ;;  %v1475_v24 = vmul.f32 %v2161_v30, %v1462_v10  ;;  %v1477_v28 = vmul.f32 %v2161_v30, %v1464_v16  ;;  %v1480_v12 = vmul.f32 %v2161_v30, %v1467_v52  ;;  %2397 = vmatpush3.bf16.msra.mxu1 %v2548_v42 }
 0x882   : > { %v1478_v45 = vmul.f32 %v2161_v30, %v1465_v18  ;;  %v1479_v51 = vmul.f32 %v2161_v30, %v1466_v20  ;;  %v1481_v5 = vmul.f32 %v2161_v30, %v1468_v1  ;;  %v1482_v15 = vmul.f32 %v2161_v30, %v1469_v54  ;;  %2398 = vmatprep.subr.bf16.mxu1 %v2549_v2 }
 0x883   : > { %v3313_v31 = vadd.f32 %v2162_v17, %v1476_v23  ;;  %v3315_v36 = vadd.f32 %v2162_v17, %v1475_v24  ;;  %v3319_v35 = vadd.f32 %v2162_v17, %v1477_v28  ;;  %v3327_v40 = vadd.f32 %v2162_v17, %v1480_v12 }
 0x884   : > { %v3321_v3 = vadd.f32 %v2162_v17, %v1478_v45  ;;  %v3325_v21 = vadd.f32 %v2162_v17, %v1479_v51  ;;  %v3331_v53 = vadd.f32 %v2162_v17, %v1481_v5  ;;  %v3333_v59 = vadd.f32 %v2162_v17, %v1482_v15 }
 0x885   : > { %v1497_v33 = vmul.f32 %v2661_v57, %v3313_v31  ;;  %v1496_v62 = vmul.f32 %v2661_v57, %v3315_v36  ;;  %v1498_v39 = vmul.f32 %v2661_v57, %v3319_v35  ;;  %v1501_v47 = vmul.f32 %v2661_v57, %v3327_v40  ;;  %2399 = vmatpush3.bf16.msra.mxu1 %v2549_v2 }
 0x886   : > { %v1499_v41 = vmul.f32 %v2661_v57, %v3321_v3  ;;  %v1500_v61 = vmul.f32 %v2661_v57, %v3325_v21  ;;  %v1502_v63 = vmul.f32 %v2661_v57, %v3331_v53  ;;  %v1503_v25 = vmul.f32 %v2661_v57, %v3333_v59  ;;  %2400 = vmatprep.subr.bf16.mxu1 %v2550_v43 }
 0x887   : > { %1506 = vadd.xlane.f32.xlu0 %v1497_v33  ;;  %1504 = vadd.xlane.f32.xlu1 %v1496_v62 }
 0x889   : > { %2401 = vmatpush3.bf16.msra.mxu1 %v2550_v43  ;;  %v2553_v43 = vld [vmem:[#allocation7 + $0xc8] sm:$0xff]  }
 0x88a   : > { %2402 = vmatprep.subr.bf16.mxu1 %v2551_v27 }
 0x88b   : > { %1508 = vadd.xlane.f32.xlu0 %v1498_v39  ;;  %1510 = vadd.xlane.f32.xlu1 %v1499_v41 }
 0x88d   : > { %2403 = vmatpush3.bf16.msra.mxu1 %v2551_v27 }
 0x88e   : > { %2404 = vmatprep.subr.bf16.mxu1 %v2552_v26 }
 0x88f   : > { %1512 = vadd.xlane.f32.xlu0 %v1500_v61  ;;  %1514 = vadd.xlane.f32.xlu1 %v1501_v47 }
 0x891   : > { %2405 = vmatpush3.bf16.msra.mxu1 %v2552_v26 }
 0x892   : > { %2406 = vmatprep.subr.bf16.mxu1 %v2553_v43 }
 0x893   : > { %1516 = vadd.xlane.f32.xlu0 %v1502_v63  ;;  %1518 = vadd.xlane.f32.xlu1 %v1503_v25 }
 0x895   : > { %2407 = vmatpush3.bf16.msra.mxu1 %v2553_v43 }
 0x910   : > { %v1507_v4 = vpop.xlane.xlu0 %1506  ;;  %v1505_v30 = vpop.xlane.xlu1 %1504 }
 0x911   : > { %v1521_v7 = vadd.f32 %v1507_v4, %v3161_v22  ;;  %v1520_v8 = vadd.f32 %v1505_v30, %v3157_v13  ;;  %v2554_v30 = vld [vmem:[#allocation7 + $0xc0] sm:$0xff]  }
 0x912   : > { %2408 = vmatprep.subr.bf16.mxu1 %v2554_v30 }
 0x913   : > { %v2164_v9 = vmul.f32 -1.442695, %v1521_v7  ;;  %v2163_v10 = vmul.f32 -1.442695, %v1520_v8  ;;  %2409 = vmatpush3.bf16.msra.mxu1 %v2554_v30 }
 0x914   : > { %v1509_v16 = vpop.xlane.xlu0 %1508  ;;  %v1511_v52 = vpop.xlane.xlu1 %1510 }
 0x915   : > { %2623 = vpow2.f32 %v2164_v9  ;;  %v1522_v17 = vadd.f32 %v1509_v16, %v3152_v6  ;;  %v1523_v18 = vadd.f32 %v1511_v52, %v3155_v11  ;;  %v1577_v16 = vsub.f32 %v3123_v44, %v3313_v31 }
 0x916   : > { %2625 = vpow2.f32 %v2163_v10  ;;  %v1576_v52 = vsub.f32 %v3114_v34, %v3315_v36 }
 0x917   : > { %v2165_v20 = vmul.f32 -1.442695, %v1522_v17  ;;  %v2166_v23 = vmul.f32 -1.442695, %v1523_v18 }
 0x918   : > { %v1513_v24 = vpop.xlane.xlu0 %1512  ;;  %v1515_v28 = vpop.xlane.xlu1 %1514 }
 0x919   : > { %2627 = vpow2.f32 %v2165_v20  ;;  %v1524_v45 = vadd.f32 %v1513_v24, %v3164_v37  ;;  %v1525_v22 = vadd.f32 %v1515_v28, %v3169_v50  ;;  %v1578_v28 = vsub.f32 %v3112_v32, %v3319_v35 }
 0x91a   : > { %2629 = vpow2.f32 %v2166_v23  ;;  %v1581_v32 = vsub.f32 %v3140_v56, %v3327_v40 }
 0x91b   : > { %v2167_v13 = vmul.f32 -1.442695, %v1524_v45  ;;  %v2168_v29 = vmul.f32 -1.442695, %v1525_v22  ;;  %v1579_v22 = vsub.f32 %v3119_v38, %v3321_v3 }
 0x91c   : > { %v1517_v14 = vpop.xlane.xlu0 %1516  ;;  %v1519_v51 = vpop.xlane.xlu1 %1518 }
 0x91d   : > { %2631 = vpow2.f32 %v2167_v13  ;;  %v1526_v6 = vadd.f32 %v1517_v14, %v3167_v46  ;;  %v1527_v11 = vadd.f32 %v1519_v51, %v3173_v60 }
 0x91e   : > { %2633 = vpow2.f32 %v2168_v29 }
 0x91f   : > { %v2169_v12 = vmul.f32 -1.442695, %v1526_v6  ;;  %v2170_v1 = vmul.f32 -1.442695, %v1527_v11  ;;  %v1580_v11 = vsub.f32 %v3138_v55, %v3325_v21 }
 0x921   : > { %2635 = vpow2.f32 %v2169_v12 }
 0x922   : > { %v2624_v54 = vpop.eup %2623  ;;  %2637 = vpow2.f32 %v2170_v1 }
 0x923   : > { %v2626_v57 = vpop.eup %2625  ;;  %v1553_v37 = vadd.f32 1.0, %v2624_v54 }
 0x924   : > { %v1552_v33 = vadd.f32 1.0, %v2626_v57 }
 0x925   : > { %2639 = vrcp.f32 %v1553_v37 }
 0x926   : > { %v2628_v50 = vpop.eup %2627  ;;  %2641 = vrcp.f32 %v1552_v33 }
 0x927   : > { %v2630_v62 = vpop.eup %2629  ;;  %v1554_v5 = vadd.f32 1.0, %v2628_v50 }
 0x928   : > { %v1555_v15 = vadd.f32 1.0, %v2630_v62 }
 0x929   : > { %2643 = vrcp.f32 %v1554_v5 }
 0x92a   : > { %v2632_v39 = vpop.eup %2631  ;;  %2645 = vrcp.f32 %v1555_v15 }
 0x92b   : > { %v2634_v46 = vpop.eup %2633  ;;  %v1556_v60 = vadd.f32 1.0, %v2632_v39 }
 0x92c   : > { %v1557_v41 = vadd.f32 1.0, %v2634_v46 }
 0x92d   : > { %2647 = vrcp.f32 %v1556_v60 }
 0x92e   : > { %v2636_v61 = vpop.eup %2635  ;;  %2649 = vrcp.f32 %v1557_v41 }
 0x92f   : > { %v2638_v47 = vpop.eup %2637  ;;  %v1558_v63 = vadd.f32 1.0, %v2636_v61 }
 0x930   : > { %v1559_v25 = vadd.f32 1.0, %v2638_v47 }
 0x931   : > { %2651 = vrcp.f32 %v1558_v63 }
 0x932   : > { %v2640_v42 = vpop.eup %2639  ;;  %2653 = vrcp.f32 %v1559_v25 }
 0x933   : > { %v2642_v2 = vpop.eup %2641  ;;  %1591 = vperm.xlu1 %2514, %v2640_v42  }
 0x934   : > { %1586 = vperm.xlu0 %2513, %v2642_v2  }
 0x936   : > { %v2644_v27 = vpop.eup %2643 }
 0x937   : > { %v2646_v4 = vpop.eup %2645  ;;  %1596 = vperm.xlu1 %2514, %v2644_v27  }
 0x938   : > { %1601 = vperm.xlu0 %2513, %v2646_v4  }
 0x93a   : > { %v2648_v7 = vpop.eup %2647 }
 0x93b   : > { %v2650_v8 = vpop.eup %2649  ;;  %1606 = vperm.xlu1 %2514, %v2648_v7  }
 0x93c   : > { %1611 = vperm.xlu0 %2513, %v2650_v8   ;;  %v2179_v8 = vld [vmem:[#allocation8 + $0x3] ss:$0 sm:$0xff] }
 0x93e   : > { %v2652_v9 = vpop.eup %2651 }
 0x93f   : > { %v2654_v10 = vpop.eup %2653  ;;  %1616 = vperm.xlu1 %2514, %v2652_v9  }
 0x940   : > { %1621 = vperm.xlu0 %2513, %v2654_v10  }
 0x9ae   : > { %v1592_v17 = vpop.permute.xlu1 %1591 }
 0x9af   : > { %v1587_v18 = vpop.permute.xlu0 %1586  ;;  %v1625_v20 = vmul.f32 %v1592_v17, %v1577_v16 }
 0x9b0   : > { %v1624_v23 = vmul.f32 %v1587_v18, %v1576_v52 }
 0x9b1   : > { %v1633_v24 = vadd.f32 %v1625_v20, %v3313_v31 }
 0x9b2   : > { %v1632_v45 = vadd.f32 %v1624_v23, %v3315_v36  ;;  %v1597_v13 = vpop.permute.xlu1 %1596 }
 0x9b3   : > { %v1641_v29 = vmax.f32 %v1633_v24, 0.0  ;;  %v1602_v44 = vpop.permute.xlu0 %1601  ;;  %v1626_v14 = vmul.f32 %v1597_v13, %v1578_v28 }
 0x9b4   : > { %v1640_v51 = vmax.f32 %v1632_v45, 0.0  ;;  %v1627_v34 = vmul.f32 %v1602_v44, %v1579_v22 }
 0x9b5   : > { %v1634_v6 = vadd.f32 %v1626_v14, %v3319_v35  ;;  %v1582_v35 = vsub.f32 %v3129_v48, %v3331_v53 }
 0x9b6   : > { %v1635_v31 = vadd.f32 %v1627_v34, %v3321_v3  ;;  %v1607_v36 = vpop.permute.xlu1 %1606  ;;  %v1648_v12 = vpack.c.bf16 %v1641_v29, %v1640_v51  ;;  %v1583_v3 = vsub.f32 %v3131_v49, %v3333_v59 }
 0x9b7   : > { %v1642_v1 = vmax.f32 %v1634_v6, 0.0  ;;  %v1612_v38 = vpop.permute.xlu0 %1611  ;;  %v1628_v54 = vmul.f32 %v1607_v36, %v1580_v11 }
 0x9b8   : > { %v1643_v57 = vmax.f32 %v1635_v31, 0.0  ;;  %v1629_v37 = vmul.f32 %v1612_v38, %v1581_v32  ;;  %2410 = vmatprep.mubr.bf16.mxu1 %v1648_v12 }
 0x9b9   : > { %v1636_v33 = vadd.f32 %v1628_v54, %v3325_v21 }
 0x9ba   : > { %v1649_v50 = vpack.c.bf16 %v1643_v57, %v1642_v1  ;;  %v1637_v55 = vadd.f32 %v1629_v37, %v3327_v40  ;;  %v1617_v56 = vpop.permute.xlu1 %1616 }
 0x9bb   : > { %v1644_v62 = vmax.f32 %v1636_v33, 0.0  ;;  %v1622_v5 = vpop.permute.xlu0 %1621  ;;  %v1630_v15 = vmul.f32 %v1617_v56, %v1582_v35 }
 0x9bc   : > { %v1645_v39 = vmax.f32 %v1637_v55, 0.0  ;;  %v1631_v46 = vmul.f32 %v1622_v5, %v1583_v3  ;;  %2411 = vmatmul.mubr.bf16.vlgmr.msra.gmra.mxu1 %v1649_v50 }
 0x9bd   : > { %v1638_v60 = vadd.f32 %v1630_v15, %v3331_v53 }
 0x9be   : > { %v1639_v21 = vadd.f32 %v1631_v46, %v3333_v59  ;;  %v1650_v41 = vpack.c.bf16 %v1645_v39, %v1644_v62 }
 0x9bf   : > { %v1646_v61 = vmax.f32 %v1638_v60, 0.0 }
 0x9c0   : > { %v1647_v48 = vmax.f32 %v1639_v21, 0.0  ;;  %2414 = vmatprep.mubr.bf16.mxu1 %v1650_v41 }
 0x9c2   : > { %v1651_v47 = vpack.c.bf16 %v1647_v48, %v1646_v61 }
 0x9c4   : > { %2415 = vmatmul.mubr.bf16.gmra.mxu1 %v1651_v47 }
 0xa7c   : > { %v2412_v40 = vpop.f32.mrf.mxu1 }
 0xa7e   : > { %v1751_v63 = vpop.f32.mrf.mxu1 }
 0xa80   : > { %v2413_v49 = vpop.f32.mrf.mxu1 }
 0xa81   : > { %v1783_v53 = vpack.c.bf16 %v2413_v49, %v2412_v40 }
 0xa82   : > { %v1754_v25 = vpop.f32.mrf.mxu1 }
 0xa83   : > { %v1782_v59 = vpack.c.bf16 %v1754_v25, %v1751_v63 }
 0xa84   : > { %v2416_v26 = vpop.f32.mrf.mxu1 }
 0xa86   : > { %v1767_v42 = vpop.f32.mrf.mxu1 }
 0xa88   : > { %v2417_v2 = vpop.f32.mrf.mxu1 }
 0xa89   : > { %v1785_v43 = vpack.c.bf16 %v2417_v2, %v2416_v26 }
 0xa8a   : > { %v1770_v27 = vpop.f32.mrf.mxu1 }
 0xa8b   : > { %v1784_v4 = vpack.c.bf16 %v1770_v27, %v1767_v42  ;;  %2418 = vmatprep.subr.bf16.mxu0 %v1785_v43 }
 0xa8c   : > { %2419 = vmatpush3.bf16.msra.mxu0 %v1785_v43 }
 0xa8d   : > { %2420 = vmatprep.subr.bf16.mxu0 %v1784_v4 }
 0xa90   : > { %2421 = vmatpush3.bf16.msra.mxu0 %v1784_v4 }
 0xa91   : > { %2422 = vmatprep.subr.bf16.mxu0 %v1783_v53 }
 0xa94   : > { %2423 = vmatpush3.bf16.msra.mxu0 %v1783_v53 }
 0xa95   : > { %2424 = vmatprep.subr.bf16.mxu0 %v1782_v59 }
 0xa98   : > { %2425 = vmatpush3.bf16.msra.mxu0 %v1782_v59 }
 0xa9b   : > { %2427 = vmatmul.mubr.msk.bf16.vlgmr.msra.gmra.mxu0 %vm484_vm0, %v3287_v58 }
 0xa9c   : > { %2430 = vmatprep.mubr.msk.bf16.mxu0 %vm484_vm0, %v3292_v19 }
 0xaa3   : > { %2431 = vmatmul.mubr.msk.bf16.gmra.mxu0 %vm484_vm0, %v3297_v0 }
 0xb5b   : > { %v2428_v30 = vpop.f32.mrf.mxu0 }
 0xb5c   : > { %v3377_v52 = vadd.f32 %v2428_v30, %v2179_v8 }
 0xb5d   : > { %v1825_v7 = vpop.f32.mrf.mxu0 }
 0xb5e   : > { %v3375_v10 = vadd.f32 %v2179_v8, %v1825_v7  ;;  %v1872_v24 = vmul.f32 %v3377_v52, %v3377_v52 }
 0xb5f   : > { %v2429_v9 = vpop.f32.mrf.mxu0 }
 0xb60   : > { %v1870_v58 = vmul.f32 %v3375_v10, %v3375_v10  ;;  %v3383_v20 = vadd.f32 %v2429_v9, %v2179_v8 }
 0xb61   : > { %v1828_v16 = vpop.f32.mrf.mxu0 }
 0xb62   : > { %v3379_v17 = vadd.f32 %v2179_v8, %v1828_v16  ;;  %v1873_v29 = vmul.f32 %v3383_v20, %v3383_v20 }
 0xb63   : > { %v2432_v18 = vpop.f32.mrf.mxu0 }
 0xb64   : > { %v1856_v19 = vadd.f32 %v3379_v17, %v3375_v10  ;;  %v1871_v0 = vmul.f32 %v3379_v17, %v3379_v17  ;;  %v1850_v51 = vadd.f32 %v2432_v18, %v2179_v8 }
 0xb65   : > { %v1841_v23 = vpop.f32.mrf.mxu0 }
 0xb66   : > { %v1857_v28 = vadd.f32 %v1856_v19, %v3377_v52  ;;  %v1878_v45 = vadd.f32 %v1871_v0, %v1870_v58  ;;  %v1842_v22 = vadd.f32 %v2179_v8, %v1841_v23  ;;  %v1876_v54 = vmul.f32 %v1850_v51, %v1850_v51 }
 0xb67   : > { %v2433_v13 = vpop.f32.mrf.mxu0 }
 0xb68   : > { %v1879_v44 = vadd.f32 %v1878_v45, %v1872_v24  ;;  %v1858_v14 = vadd.f32 %v1857_v28, %v3383_v20  ;;  %v1874_v11 = vmul.f32 %v1842_v22, %v1842_v22  ;;  %v1853_v12 = vadd.f32 %v2433_v13, %v2179_v8 }
 0xb69   : > { %v1844_v34 = vpop.f32.mrf.mxu0 }
 0xb6a   : > { %v1859_v6 = vadd.f32 %v1858_v14, %v1842_v22  ;;  %v1880_v31 = vadd.f32 %v1879_v44, %v1873_v29  ;;  %v1845_v32 = vadd.f32 %v2179_v8, %v1844_v34  ;;  %v1877_v33 = vmul.f32 %v1853_v12, %v1853_v12  ;;  %v2184_v8 = vld [vmem:[#allocation8 + $0x6] ss:$0 sm:$0xff] }
 0xb6c   : > { %v1881_v36 = vadd.f32 %v1880_v31, %v1874_v11  ;;  %v1860_v1 = vadd.f32 %v1859_v6, %v1845_v32  ;;  %v1875_v38 = vmul.f32 %v1845_v32, %v1845_v32 }
 0xb6e   : > { %v1861_v57 = vadd.f32 %v1860_v1, %v1850_v51  ;;  %v1882_v37 = vadd.f32 %v1881_v36, %v1875_v38 }
 0xb70   : > { %v1862_v35 = vadd.f32 %v1861_v57, %v1853_v12  ;;  %v1883_v50 = vadd.f32 %v1882_v37, %v1876_v54 }
 0xb72   : > { %v1863_v55 = vrot.slane %v1862_v35, 4  ;;  %v1884_v3 = vadd.f32 %v1883_v50, %v1877_v33 }
 0xb74   : > { %v1864_v56 = vadd.f32 %v1863_v55, %v1862_v35  ;;  %v1885_v62 = vrot.slane %v1884_v3, 4 }
 0xb76   : > { %v1865_v5 = vrot.slane %v1864_v56, 2  ;;  %v1886_v15 = vadd.f32 %v1885_v62, %v1884_v3 }
 0xb78   : > { %v1866_v39 = vadd.f32 %v1865_v5, %v1864_v56  ;;  %v1887_v46 = vrot.slane %v1886_v15, 2 }
 0xb7a   : > { %v1867_v60 = vrot.slane %v1866_v39, 1  ;;  %v1888_v21 = vadd.f32 %v1887_v46, %v1886_v15 }
 0xb7c   : > { %v1868_v41 = vadd.f32 %v1867_v60, %v1866_v39  ;;  %v1889_v61 = vrot.slane %v1888_v21, 1 }
 0xb7e   : > { %v1869_v48 = vmul.f32 0.015625, %v1868_v41  ;;  %v1890_v47 = vadd.f32 %v1889_v61, %v1888_v21 }
 0xb80   : > { %v1891_v40 = vmul.f32 0.015625, %v1890_v47  ;;  %v1892_v63 = vmul.f32 %v1869_v48, %v1869_v48  ;;  %v1895_v42 = vsub.f32 %v3375_v10, %v1869_v48  ;;  %v1896_v2 = vsub.f32 %v3379_v17, %v1869_v48  ;;  %v2185_v17 = vld [vmem:[#allocation8 + $0x9] ss:$0 sm:$0xff] }
 0xb81   : > { %v1897_v43 = vsub.f32 %v3377_v52, %v1869_v48  ;;  %v1898_v27 = vsub.f32 %v3383_v20, %v1869_v48  ;;  %v1899_v53 = vsub.f32 %v1842_v22, %v1869_v48  ;;  %v1900_v59 = vsub.f32 %v1845_v32, %v1869_v48 }
 0xb82   : > { %v1893_v49 = vsub.f32 %v1891_v40, %v1892_v63  ;;  %v1901_v30 = vsub.f32 %v1850_v51, %v1869_v48  ;;  %v1902_v7 = vsub.f32 %v1853_v12, %v1869_v48 }
 0xb84   : > { %v1894_v25 = vmax.f32 %v1893_v49, 0.0 }
 0xb86   : > { %v1903_v26 = vadd.f32 1e-05, %v1894_v25 }
 0xb88   : > { %2655 = vrsqrt.f32 %v1903_v26 }
 0xb95   : > { %v2656_v4 = vpop.eup %2655 }
 0xb96   : > { %v1905_v9 = vmul.f32 %v2656_v4, %v1895_v42  ;;  %v1906_v16 = vmul.f32 %v2656_v4, %v1896_v2  ;;  %v1907_v18 = vmul.f32 %v2656_v4, %v1897_v43  ;;  %v1908_v58 = vmul.f32 %v2656_v4, %v1898_v27 }
 0xb97   : > { %v1909_v19 = vmul.f32 %v2656_v4, %v1899_v53  ;;  %v1910_v0 = vmul.f32 %v2656_v4, %v1900_v59  ;;  %v1911_v10 = vmul.f32 %v2656_v4, %v1901_v30  ;;  %v1912_v23 = vmul.f32 %v2656_v4, %v1902_v7 }
 0xb98   : > { %v1918_v52 = vmul.f32 %v2184_v8, %v1905_v9  ;;  %v1919_v20 = vmul.f32 %v2184_v8, %v1906_v16  ;;  %v1920_v24 = vmul.f32 %v2184_v8, %v1907_v18  ;;  %v1921_v28 = vmul.f32 %v2184_v8, %v1908_v58 }
 0xb99   : > { %v1922_v45 = vmul.f32 %v2184_v8, %v1909_v19  ;;  %v1923_v22 = vmul.f32 %v2184_v8, %v1910_v0  ;;  %v1924_v13 = vmul.f32 %v2184_v8, %v1911_v10  ;;  %v1925_v29 = vmul.f32 %v2184_v8, %v1912_v23 }
 0xb9a   : > { %v1931_v44 = vadd.f32 %v2185_v17, %v1918_v52  ;;  %v1932_v14 = vadd.f32 %v2185_v17, %v1919_v20  ;;  %v1933_v51 = vadd.f32 %v2185_v17, %v1920_v24  ;;  %v1934_v34 = vadd.f32 %v2185_v17, %v1921_v28 }
 0xb9b   : > { %v1935_v6 = vadd.f32 %v2185_v17, %v1922_v45  ;;  %v1936_v11 = vadd.f32 %v2185_v17, %v1923_v22  ;;  %v1937_v31 = vadd.f32 %v2185_v17, %v1924_v13  ;;  %v1938_v32 = vadd.f32 %v2185_v17, %v1925_v29 }
 0xb9c   : > { %1939 = vst [vmem:[%s284_s30] sm:$0xff] %v1931_v44  ;;  %1940 = vst [vmem:[%s284_s30 + $0x8] sm:$0xff] %v1932_v14 }
 0xb9d   : > { %1941 = vst [vmem:[%s284_s30 + $0x10] sm:$0xff] %v1933_v51  ;;  %1942 = vst [vmem:[%s284_s30 + $0x18] sm:$0xff] %v1934_v34 }
 0xb9e   : > { %1943 = vst [vmem:[%s284_s30 + $0x20] sm:$0xff] %v1935_v6  ;;  %1944 = vst [vmem:[%s284_s30 + $0x28] sm:$0xff] %v1936_v11 }
 0xb9f   : > { %1945 = vst [vmem:[%s284_s30 + $0x30] sm:$0xff] %v1937_v31  ;;  %1946 = vst [vmem:[%s284_s30 + $0x38] sm:$0xff] %v1938_v32 }
 0xba0   : > { %2783 = shalt.err (!%p2780_p4)
}
 0xba1   : > { %s2784_s28 = scalar_lea.hbm %s3404_s20, 1024  ;;  %s2788_s10 = scalar_lea.hbm %s3452_s4, 8192 }
 0xba2   : > { %p2785_p0 = scmp.ne.s32.totalorder %s3404_s20, %s2784_s28  ;;  %p2789_p2 = scmp.lt.s32.totalorder %s3404_s20, %s3452_s4 }
 0xba3   : > { %p2790_p6 = scmp.lt.s32.totalorder %s2788_s10, %s2784_s28 }
 0xba4   : > { %p2786_p7 = pnand %p2785_p0, %p3475_p3 }
 0xba5   : > { %p2791_p11 = por %p2790_p6, %p2789_p2 }
 0xba6   : > { %p2787_p8 = pneg %p2786_p7 }
 0xba8   : > { %p2792_p13 = pnand %p2791_p11, %p2787_p8 }
 0xbaa   : > { %2795 = shalt.err (!%p2792_p13)
}
 0xbab   : > { %s2858_s21 = smov 128   ;;  %s2859_s29 = smov 8  }
 0xbac   : > { %2446 = dma.vmem_to_hbm [thread:$0]  (%p3475_p3), %s3406_s8, 1024, %s3404_s20, %s1948_s19, %s2858_s21, %s2858_s21, %s2859_s29  }
 0xbad PF: > { %p2471_p5 = scmp.ge.s32.totalorder %s2846_s18, 2  ;;  %s1976_s30 = sand.u32 1, %s2834_s15  }
 0xbae   : > { %p3476_p10 = scmp.ne.s32.totalorder %s3462_s22, 0  ;;  %s1977_s12 = scalar_lea.sflag [#allocation4], %s1976_s30 }
 0xbb0   : > { %p2463_p9 = pnand %p2471_p5, %p3476_p10 }
 0xbb2   : > { %p2464_p12 = pneg %p2463_p9 }
 0xbb4   : > { %2829 = dma.done.wait (%p2464_p12), %s1977_s12, 1024  }
 0xbb5   : > { %2831 = vsyncadd (%p2464_p12), %s1977_s12, 4294966272  ;;  %p21_p1 = scmp.ge.s32.totalorder %s2959_s13, 10   ;;  %s3477_s15 = smov %s2838_s16 }
 0xbb6   : > { %s3478_s16 = smov %s2842_s17  ;;  %s3479_s17 = smov %s2968_s24 }
 0xbb7   : > { %s3480_s18 = smov %s2959_s13  ;;  %23 = sbr.rel (!%p21_p1) target bundleno = 10 (0xa), region = 105 }
 0xbbc   :  { %1982 = vsyncpa [#allocation3], 1 }
 0xbbd   :  { %1984 = vsyncpa [#allocation3 + $0x1], 1 }
 0xbbe   :  { %1985 = vsyncpa [#allocation6], 1 }
 0xbbf   :  { %1987 = vsyncpa [#allocation6 + $0x1], 1 }
 0xbc0   :  { %1988 = vsyncpa [#allocation9], 1 }
 0xbc1   :  { %1989 = vsyncpa [#allocation4], 1 }
 0xbc2   :  { %1991 = vsyncpa [#allocation4 + $0x1], 1 }

</bundles_post_ra>
